<compile_context>
chip_gen: v5e
topology: v5e:2x2
jax: 0.10.0
libtpu: 0.0.40
codegen_flags: <defaults>
</compile_context>

<pallas_src>
import jax
import jax.numpy as jnp
import numpy as np
from jax.experimental import pallas as pl
from jax.experimental.pallas import tpu as pltpu


def resblock_kernel(x_ref, w1_ref, b1_ref, w2_ref, b2_ref, o_ref,
                    xp_ref, hp_ref):
    """Fused ResBlock for one (batch, row-strip) grid point.

    x_ref : (1, H, W, C)          whole input image (VMEM-resident, NHWC)
    w*_ref: (9, C, C)             conv weights, (kh*kw, Cin, Cout)
    b*_ref: (1, C)                biases (f32)
    o_ref : (1, tH, W, C)         output strip
    xp_ref: (tH+4, W+2, C)        scratch: reflection-padded x strip
    hp_ref: (tH+2, W+2, C)        scratch: reflection-padded h strip
    """
    _, H, W, C = x_ref.shape
    _, tH, _, _ = o_ref.shape
    s = pl.program_id(1)
    r0 = pl.multiple_of(s * tH, tH)            # first output row of this strip
    cdt = xp_ref.dtype                          # MXU operand dtype (f32/bf16)

    # ---- reflection-padded x strip: x rows [r0-2, r0+tH+1] ------------------
    def src_row(q):
        q = jnp.where(q == -1, 1, q)            # ReflectionPad2d bottom edge
        q = jnp.where(q == H, H - 2, q)         # ReflectionPad2d top edge
        return jnp.clip(q, 0, H - 1)            # clamp don't-care halo rows

    # Bulk interior rows (always in range): xp rows 2..tH+1 <- x rows r0..r0+tH-1.
    xp_ref[2:tH + 2, 1:W + 1, :] = x_ref[0, pl.ds(r0, tH), :, :].astype(cdt)
    # Four boundary/halo rows (reflected or don't-care-clamped).
    for a, off in ((0, -2), (1, -1), (tH + 2, tH), (tH + 3, tH + 1)):
        q = src_row(r0 + off)
        xp_ref[a:a + 1, 1:W + 1, :] = x_ref[0, pl.ds(q, 1), :, :].astype(cdt)
    # Column reflection (also fills the corners correctly).
    xp_ref[:, 0:1, :] = xp_ref[:, 2:3, :]
    xp_ref[:, W + 1:W + 2, :] = xp_ref[:, W - 1:W, :]

    def conv3x3(src_ref, nrows, w_ref, b_ref):
        # 3x3 "valid" conv over the padded strip: nine accumulating K=C MXU
        # matmuls straight from VMEM slices (no im2col scratch), f32 acc.
        # NOTE: the tap reshape is layout-free when W % 8 == 0.
        acc = None
        for k in range(9):
            dh, dw = divmod(k, 3)
            tap = src_ref[dh:dh + nrows, dw:dw + W, :].reshape(nrows * W, C)
            p = jnp.dot(tap, w_ref[k], preferred_element_type=jnp.float32)
            acc = p if acc is None else acc + p
        return acc + b_ref[...]                 # (nrows*W, C) float32

    # ---- conv1 + bias + ReLU over h rows [r0-1, r0+tH] (halo recomputed) ----
    h = jnp.maximum(conv3x3(xp_ref, tH + 2, w1_ref, b1_ref), 0.0)
    hp_ref[:, 1:W + 1, :] = h.reshape(tH + 2, W, C).astype(cdt)

    # Row reflection of h at the image boundary: overwrite the halo rows that
    # were computed from don't-care padding on the first / last strip.
    @pl.when(s == 0)
    def _():
        hp_ref[0:1, 1:W + 1, :] = hp_ref[2:3, 1:W + 1, :]          # h row 1

    @pl.when(s == pl.num_programs(1) - 1)
    def _():
        hp_ref[tH + 1:tH + 2, 1:W + 1, :] = hp_ref[tH - 1:tH, 1:W + 1, :]

    # Column reflection of h (after the row fix-ups, so corners are right).
    hp_ref[:, 0:1, :] = hp_ref[:, 2:3, :]
    hp_ref[:, W + 1:W + 2, :] = hp_ref[:, W - 1:W, :]

    # ---- conv2 + bias + residual --------------------------------------------
    y = conv3x3(hp_ref, tH, w2_ref, b2_ref).reshape(tH, W, C)
    res = x_ref[0, pl.ds(r0, tH), :, :].astype(jnp.float32)
    o_ref[0] = (y + res).astype(o_ref.dtype)


def _pick_row_tile(H, W, C, scratch_itemsize, budget_bytes=12 << 20):
    """Largest divisor of H whose per-strip VMEM scratch fits the budget."""
    c_pad = max(C, 128)                         # rough lane-padding estimate
    for t in range(H, 0, -1):
        if H % t:
            continue
        scratch = ((t + 4) + (t + 2)) * (W + 2) * c_pad * scratch_itemsize
        if scratch <= budget_bytes:
            return t
    return 1


def resblock_forward(x_nchw, w1, b1, w2, b2, *, use_bf16_matmul=False,
                     row_tile=None):
    """x_nchw: (N, C, H, W).  Weights are HWIO (3,3,Cin,Cout); biases (C,)."""
    x = jnp.transpose(x_nchw, (0, 2, 3, 1))                    # NHWC
    N, H, W, C = x.shape
    assert H >= 2 and W >= 2, "ReflectionPad2d(1) requires H >= 2 and W >= 2"

    cdt = jnp.bfloat16 if use_bf16_matmul else jnp.float32
    c_bytes = jnp.dtype(cdt).itemsize
    if row_tile is None:
        row_tile = _pick_row_tile(H, W, C, c_bytes)
    tH = int(row_tile)
    assert H % tH == 0, "row_tile must divide H"
    S = H // tH

    # Weights as (9, Cin, Cout) so each tap slice w_ref[k] is tile-aligned.
    w1f = jnp.asarray(w1, jnp.float32).reshape(9, C, C).astype(cdt)
    w2f = jnp.asarray(w2, jnp.float32).reshape(9, C, C).astype(cdt)
    b1r = jnp.asarray(b1, jnp.float32).reshape(1, C)
    b2r = jnp.asarray(b2, jnp.float32).reshape(1, C)

    in_bytes = x.dtype.itemsize
    need = (2 * H * W * C * in_bytes            # resident input block (x2 buf)
            + 2 * tH * W * C * in_bytes         # output strip (x2 buf)
            + 2 * 2 * 9 * C * C * c_bytes       # both weight tensors (x2 buf)
            + (tH + 4) * (W + 2) * C * c_bytes  # xp scratch
            + (tH + 2) * (W + 2) * C * c_bytes) # hp scratch
    vmem_limit = int(min(100 << 20, max(32 << 20, int(1.5 * need) + (4 << 20))))

    y = pl.pallas_call(
        resblock_kernel,
        out_shape=jax.ShapeDtypeStruct((N, H, W, C), x.dtype),
        grid=(N, S),
        in_specs=[
            # Whole image, constant over the strip axis -> stays VMEM-resident.
            pl.BlockSpec((1, H, W, C), lambda n, s: (n, 0, 0, 0)),
            pl.BlockSpec((9, C, C), lambda n, s: (0, 0, 0)),
            pl.BlockSpec((1, C), lambda n, s: (0, 0)),
            pl.BlockSpec((9, C, C), lambda n, s: (0, 0, 0)),
            pl.BlockSpec((1, C), lambda n, s: (0, 0)),
        ],
        out_specs=pl.BlockSpec((1, tH, W, C), lambda n, s: (n, s, 0, 0)),
        scratch_shapes=[
            pltpu.VMEM((tH + 4, W + 2, C), cdt),   # padded x strip (2-row halo)
            pltpu.VMEM((tH + 2, W + 2, C), cdt),   # padded h strip (1-row halo)
        ],
        compiler_params=pltpu.CompilerParams(
            dimension_semantics=("parallel", "parallel"),
            vmem_limit_bytes=vmem_limit),
    )(x, w1f, b1r, w2f, b2r)
    return jnp.transpose(y, (0, 3, 1, 2))                      # back to NCHW


def resblock_reference(x_nchw, w1, b1, w2, b2):
    """Pure-JAX reference (same semantics as the PyTorch module, norm=False)."""
    x = jnp.transpose(x_nchw, (0, 2, 3, 1))
    dn = jax.lax.conv_dimension_numbers(x.shape, w1.shape,
                                        ("NHWC", "HWIO", "NHWC"))

    def conv(inp, w, b):
        p = jnp.pad(inp, ((0, 0), (1, 1), (1, 1), (0, 0)), mode="reflect")
        o = jax.lax.conv_general_dilated(p, w, (1, 1), "VALID",
                                         dimension_numbers=dn)
        return o + b.reshape(1, 1, 1, -1)

    h = jax.nn.relu(conv(x, w1, b1))
    y = conv(h, w2, b2) + x
    return jnp.transpose(y, (0, 3, 1, 2))


if __name__ == "__main__":
    N, C, H, W = 2, 4, 16, 16
    key = jax.random.PRNGKey(0)
    kx, kw1, kb1, kw2, kb2 = jax.random.split(key, 5)

    x = jax.random.normal(kx, (N, C, H, W), dtype=jnp.float32)

    # Deterministic parameter init (Conv2d-like uniform, HWIO layout).
    fan_in = C * 3 * 3
    bound = 1.0 / np.sqrt(fan_in)
    w1 = jax.random.uniform(kw1, (3, 3, C, C), jnp.float32, -bound, bound)
    b1 = jax.random.uniform(kb1, (C,), jnp.float32, -bound, bound)
    w2 = jax.random.uniform(kw2, (3, 3, C, C), jnp.float32, -bound, bound)
    b2 = jax.random.uniform(kb2, (C,), jnp.float32, -bound, bound)

    y_ref = jax.block_until_ready(resblock_reference(x, w1, b1, w2, b2))

    # Multi-strip path (first / middle / last strips exercised).
    y = jax.block_until_ready(
        resblock_forward(x, w1, b1, w2, b2, row_tile=4))
    np.testing.assert_allclose(np.asarray(y), np.asarray(y_ref),
                               rtol=1e-4, atol=1e-4)

    # Single-strip path (strip is both first and last).
    y1 = jax.block_until_ready(
        resblock_forward(x, w1, b1, w2, b2, row_tile=16))
    np.testing.assert_allclose(np.asarray(y1), np.asarray(y_ref),
                               rtol=1e-4, atol=1e-4)

    # bf16 MXU-operand path (f32 accumulation), looser tolerance.
    yb = jax.block_until_ready(
        resblock_forward(x, w1, b1, w2, b2, use_bf16_matmul=True, row_tile=8))
    np.testing.assert_allclose(np.asarray(yb), np.asarray(y_ref),
                               rtol=5e-2, atol=5e-2)

    print("KERNEL_OK")
</pallas_src>

<mosaic_0001>
module attributes {stable_mosaic.version = 11 : i64} {
  func.func @resblock_kernel(%arg0: i32, %arg1: i32, %arg2: memref<1x16x16x4xf32, #tpu.memory_space<vmem>>, %arg3: memref<9x4x4xf32, #tpu.memory_space<vmem>>, %arg4: memref<1x4xf32, #tpu.memory_space<vmem>>, %arg5: memref<9x4x4xf32, #tpu.memory_space<vmem>>, %arg6: memref<1x4xf32, #tpu.memory_space<vmem>>, %arg7: memref<1x4x16x4xf32, #tpu.memory_space<vmem>>, %arg8: memref<8x18x4xf32, #tpu.memory_space<vmem>>, %arg9: memref<6x18x4xf32, #tpu.memory_space<vmem>>) attributes {dimension_semantics = [#tpu.dimension_semantics<parallel>, #tpu.dimension_semantics<parallel>], iteration_bounds = array<i64: 2, 4>, scalar_prefetch = 0 : i64, scratch_operands = 2 : i64, tpu.core_type = #tpu.core_type<tc>, window_params = [{transform_indices = @transform_0, window_bounds = array<i64: 1, 16, 16, 4>}, {pipeline_mode = #tpu.pipeline_mode<synchronous>, transform_indices = @transform_1, window_bounds = array<i64: 9, 4, 4>}, {pipeline_mode = #tpu.pipeline_mode<synchronous>, transform_indices = @transform_2, window_bounds = array<i64: 1, 4>}, {pipeline_mode = #tpu.pipeline_mode<synchronous>, transform_indices = @transform_3, window_bounds = array<i64: 9, 4, 4>}, {pipeline_mode = #tpu.pipeline_mode<synchronous>, transform_indices = @transform_4, window_bounds = array<i64: 1, 4>}, {transform_indices = @transform_5, window_bounds = array<i64: 1, 4, 16, 4>}]} {
    %c4_i32 = arith.constant 4 : i32
    %0 = arith.muli %arg1, %c4_i32 : i32
    %1 = tpu.assume_multiple %0, 4 : i32
    %c0 = arith.constant 0 : index
    %2 = arith.index_cast %1 : i32 to index
    %c0_0 = arith.constant 0 : index
    %c0_1 = arith.constant 0 : index
    %3 = vector.load %arg2[%c0, %2, %c0_0, %c0_1] : memref<1x16x16x4xf32, #tpu.memory_space<vmem>>, vector<1x4x16x4xf32>
    %4 = vector.shape_cast %3 : vector<1x4x16x4xf32> to vector<4x16x4xf32>
    %c2 = arith.constant 2 : index
    %c1 = arith.constant 1 : index
    %c0_2 = arith.constant 0 : index
    %5 = vector.load %arg8[%c2, %c1, %c0_2] : memref<8x18x4xf32, #tpu.memory_space<vmem>>, vector<4x16x4xf32>
    tpu.vector_store %arg8[%c2, %c1, %c0_2], %4 {strides = array<i32>} : memref<8x18x4xf32, #tpu.memory_space<vmem>>, vector<4x16x4xf32>,
    %c-2_i32 = arith.constant -2 : i32
    %6 = arith.addi %1, %c-2_i32 : i32
    %c-1_i32 = arith.constant -1 : i32
    %7 = arith.cmpi eq, %6, %c-1_i32 : i32
    %c1_i32 = arith.constant 1 : i32
    %8 = arith.select %7, %c1_i32, %6 : i32
    %c16_i32 = arith.constant 16 : i32
    %9 = arith.cmpi eq, %8, %c16_i32 : i32
    %c14_i32 = arith.constant 14 : i32
    %10 = arith.select %9, %c14_i32, %8 : i32
    %c0_i32 = arith.constant 0 : i32
    %c15_i32 = arith.constant 15 : i32
    %11 = arith.maxsi %c0_i32, %10 : i32
    %12 = arith.minsi %c15_i32, %11 : i32
    %c0_3 = arith.constant 0 : index
    %13 = arith.index_cast %12 : i32 to index
    %c0_4 = arith.constant 0 : index
    %c0_5 = arith.constant 0 : index
    %14 = vector.load %arg2[%c0_3, %13, %c0_4, %c0_5] : memref<1x16x16x4xf32, #tpu.memory_space<vmem>>, vector<1x1x16x4xf32>
    %15 = vector.shape_cast %14 : vector<1x1x16x4xf32> to vector<1x16x4xf32>
    %c0_6 = arith.constant 0 : index
    %c1_7 = arith.constant 1 : index
    %c0_8 = arith.constant 0 : index
    %16 = vector.load %arg8[%c0_6, %c1_7, %c0_8] : memref<8x18x4xf32, #tpu.memory_space<vmem>>, vector<1x16x4xf32>
    tpu.vector_store %arg8[%c0_6, %c1_7, %c0_8], %15 {strides = array<i32>} : memref<8x18x4xf32, #tpu.memory_space<vmem>>, vector<1x16x4xf32>,
    %c-1_i32_9 = arith.constant -1 : i32
    %17 = arith.addi %1, %c-1_i32_9 : i32
    %c-1_i32_10 = arith.constant -1 : i32
    %18 = arith.cmpi eq, %17, %c-1_i32_10 : i32
    %c1_i32_11 = arith.constant 1 : i32
    %19 = arith.select %18, %c1_i32_11, %17 : i32
    %c16_i32_12 = arith.constant 16 : i32
    %20 = arith.cmpi eq, %19, %c16_i32_12 : i32
    %c14_i32_13 = arith.constant 14 : i32
    %21 = arith.select %20, %c14_i32_13, %19 : i32
    %c0_i32_14 = arith.constant 0 : i32
    %c15_i32_15 = arith.constant 15 : i32
    %22 = arith.maxsi %c0_i32_14, %21 : i32
    %23 = arith.minsi %c15_i32_15, %22 : i32
    %c0_16 = arith.constant 0 : index
    %24 = arith.index_cast %23 : i32 to index
    %c0_17 = arith.constant 0 : index
    %c0_18 = arith.constant 0 : index
    %25 = vector.load %arg2[%c0_16, %24, %c0_17, %c0_18] : memref<1x16x16x4xf32, #tpu.memory_space<vmem>>, vector<1x1x16x4xf32>
    %26 = vector.shape_cast %25 : vector<1x1x16x4xf32> to vector<1x16x4xf32>
    %c1_19 = arith.constant 1 : index
    %c1_20 = arith.constant 1 : index
    %c0_21 = arith.constant 0 : index
    %27 = vector.load %arg8[%c1_19, %c1_20, %c0_21] : memref<8x18x4xf32, #tpu.memory_space<vmem>>, vector<1x16x4xf32>
    tpu.vector_store %arg8[%c1_19, %c1_20, %c0_21], %26 {strides = array<i32>} : memref<8x18x4xf32, #tpu.memory_space<vmem>>, vector<1x16x4xf32>,
    %c4_i32_22 = arith.constant 4 : i32
    %28 = arith.addi %1, %c4_i32_22 : i32
    %c-1_i32_23 = arith.constant -1 : i32
    %29 = arith.cmpi eq, %28, %c-1_i32_23 : i32
    %c1_i32_24 = arith.constant 1 : i32
    %30 = arith.select %29, %c1_i32_24, %28 : i32
    %c16_i32_25 = arith.constant 16 : i32
    %31 = arith.cmpi eq, %30, %c16_i32_25 : i32
    %c14_i32_26 = arith.constant 14 : i32
    %32 = arith.select %31, %c14_i32_26, %30 : i32
    %c0_i32_27 = arith.constant 0 : i32
    %c15_i32_28 = arith.constant 15 : i32
    %33 = arith.maxsi %c0_i32_27, %32 : i32
    %34 = arith.minsi %c15_i32_28, %33 : i32
    %c0_29 = arith.constant 0 : index
    %35 = arith.index_cast %34 : i32 to index
    %c0_30 = arith.constant 0 : index
    %c0_31 = arith.constant 0 : index
    %36 = vector.load %arg2[%c0_29, %35, %c0_30, %c0_31] : memref<1x16x16x4xf32, #tpu.memory_space<vmem>>, vector<1x1x16x4xf32>
    %37 = vector.shape_cast %36 : vector<1x1x16x4xf32> to vector<1x16x4xf32>
    %c6 = arith.constant 6 : index
    %c1_32 = arith.constant 1 : index
    %c0_33 = arith.constant 0 : index
    %38 = vector.load %arg8[%c6, %c1_32, %c0_33] : memref<8x18x4xf32, #tpu.memory_space<vmem>>, vector<1x16x4xf32>
    tpu.vector_store %arg8[%c6, %c1_32, %c0_33], %37 {strides = array<i32>} : memref<8x18x4xf32, #tpu.memory_space<vmem>>, vector<1x16x4xf32>,
    %c5_i32 = arith.constant 5 : i32
    %39 = arith.addi %1, %c5_i32 : i32
    %c-1_i32_34 = arith.constant -1 : i32
    %40 = arith.cmpi eq, %39, %c-1_i32_34 : i32
    %c1_i32_35 = arith.constant 1 : i32
    %41 = arith.select %40, %c1_i32_35, %39 : i32
    %c16_i32_36 = arith.constant 16 : i32
    %42 = arith.cmpi eq, %41, %c16_i32_36 : i32
    %c14_i32_37 = arith.constant 14 : i32
    %43 = arith.select %42, %c14_i32_37, %41 : i32
    %c0_i32_38 = arith.constant 0 : i32
    %c15_i32_39 = arith.constant 15 : i32
    %44 = arith.maxsi %c0_i32_38, %43 : i32
    %45 = arith.minsi %c15_i32_39, %44 : i32
    %c0_40 = arith.constant 0 : index
    %46 = arith.index_cast %45 : i32 to index
    %c0_41 = arith.constant 0 : index
    %c0_42 = arith.constant 0 : index
    %47 = vector.load %arg2[%c0_40, %46, %c0_41, %c0_42] : memref<1x16x16x4xf32, #tpu.memory_space<vmem>>, vector<1x1x16x4xf32>
    %48 = vector.shape_cast %47 : vector<1x1x16x4xf32> to vector<1x16x4xf32>
    %c7 = arith.constant 7 : index
    %c1_43 = arith.constant 1 : index
    %c0_44 = arith.constant 0 : index
    %49 = vector.load %arg8[%c7, %c1_43, %c0_44] : memref<8x18x4xf32, #tpu.memory_space<vmem>>, vector<1x16x4xf32>
    tpu.vector_store %arg8[%c7, %c1_43, %c0_44], %48 {strides = array<i32>} : memref<8x18x4xf32, #tpu.memory_space<vmem>>, vector<1x16x4xf32>,
    %c0_45 = arith.constant 0 : index
    %c2_46 = arith.constant 2 : index
    %c0_47 = arith.constant 0 : index
    %50 = vector.load %arg8[%c0_45, %c2_46, %c0_47] : memref<8x18x4xf32, #tpu.memory_space<vmem>>, vector<8x1x4xf32>
    %c0_48 = arith.constant 0 : index
    %c0_49 = arith.constant 0 : index
    %c0_50 = arith.constant 0 : index
    %51 = vector.load %arg8[%c0_48, %c0_49, %c0_50] : memref<8x18x4xf32, #tpu.memory_space<vmem>>, vector<8x1x4xf32>
    tpu.vector_store %arg8[%c0_48, %c0_49, %c0_50], %50 {strides = array<i32>} : memref<8x18x4xf32, #tpu.memory_space<vmem>>, vector<8x1x4xf32>,
    %c0_51 = arith.constant 0 : index
    %c15 = arith.constant 15 : index
    %c0_52 = arith.constant 0 : index
    %52 = vector.load %arg8[%c0_51, %c15, %c0_52] : memref<8x18x4xf32, #tpu.memory_space<vmem>>, vector<8x1x4xf32>
    %c0_53 = arith.constant 0 : index
    %c17 = arith.constant 17 : index
    %c0_54 = arith.constant 0 : index
    %53 = vector.load %arg8[%c0_53, %c17, %c0_54] : memref<8x18x4xf32, #tpu.memory_space<vmem>>, vector<8x1x4xf32>
    tpu.vector_store %arg8[%c0_53, %c17, %c0_54], %52 {strides = array<i32>} : memref<8x18x4xf32, #tpu.memory_space<vmem>>, vector<8x1x4xf32>,
    %c0_55 = arith.constant 0 : index
    %c0_56 = arith.constant 0 : index
    %c0_57 = arith.constant 0 : index
    %54 = vector.load %arg8[%c0_55, %c0_56, %c0_57] : memref<8x18x4xf32, #tpu.memory_space<vmem>>, vector<6x16x4xf32>
    %55 = vector.shape_cast %54 : vector<6x16x4xf32> to vector<96x4xf32>
    %c0_58 = arith.constant 0 : index
    %c0_59 = arith.constant 0 : index
    %c0_60 = arith.constant 0 : index
    %56 = vector.load %arg3[%c0_58, %c0_59, %c0_60] : memref<9x4x4xf32, #tpu.memory_space<vmem>>, vector<1x4x4xf32>
    %57 = vector.shape_cast %56 : vector<1x4x4xf32> to vector<4x4xf32>
    %cst = arith.constant dense<0.000000e+00> : vector<96x4xf32>
    %58 = tpu.matmul %55, %57, %cst {dimension_numbers = #tpu.dot_dimension_numbers<[1], [0], [0], [1], [0, 0, 1, 1], [], []>} : vector<96x4xf32>, vector<4x4xf32>, vector<96x4xf32> -> vector<96x4xf32>
    %c0_61 = arith.constant 0 : index
    %c1_62 = arith.constant 1 : index
    %c0_63 = arith.constant 0 : index
    %59 = vector.load %arg8[%c0_61, %c1_62, %c0_63] : memref<8x18x4xf32, #tpu.memory_space<vmem>>, vector<6x16x4xf32>
    %60 = vector.shape_cast %59 : vector<6x16x4xf32> to vector<96x4xf32>
    %c1_64 = arith.constant 1 : index
    %c0_65 = arith.constant 0 : index
    %c0_66 = arith.constant 0 : index
    %61 = vector.load %arg3[%c1_64, %c0_65, %c0_66] : memref<9x4x4xf32, #tpu.memory_space<vmem>>, vector<1x4x4xf32>
    %62 = vector.shape_cast %61 : vector<1x4x4xf32> to vector<4x4xf32>
    %cst_67 = arith.constant dense<0.000000e+00> : vector<96x4xf32>
    %63 = tpu.matmul %60, %62, %cst_67 {dimension_numbers = #tpu.dot_dimension_numbers<[1], [0], [0], [1], [0, 0, 1, 1], [], []>} : vector<96x4xf32>, vector<4x4xf32>, vector<96x4xf32> -> vector<96x4xf32>
    %64 = arith.addf %58, %63 : vector<96x4xf32>
    %c0_68 = arith.constant 0 : index
    %c2_69 = arith.constant 2 : index
    %c0_70 = arith.constant 0 : index
    %65 = vector.load %arg8[%c0_68, %c2_69, %c0_70] : memref<8x18x4xf32, #tpu.memory_space<vmem>>, vector<6x16x4xf32>
    %66 = vector.shape_cast %65 : vector<6x16x4xf32> to vector<96x4xf32>
    %c2_71 = arith.constant 2 : index
    %c0_72 = arith.constant 0 : index
    %c0_73 = arith.constant 0 : index
    %67 = vector.load %arg3[%c2_71, %c0_72, %c0_73] : memref<9x4x4xf32, #tpu.memory_space<vmem>>, vector<1x4x4xf32>
    %68 = vector.shape_cast %67 : vector<1x4x4xf32> to vector<4x4xf32>
    %cst_74 = arith.constant dense<0.000000e+00> : vector<96x4xf32>
    %69 = tpu.matmul %66, %68, %cst_74 {dimension_numbers = #tpu.dot_dimension_numbers<[1], [0], [0], [1], [0, 0, 1, 1], [], []>} : vector<96x4xf32>, vector<4x4xf32>, vector<96x4xf32> -> vector<96x4xf32>
    %70 = arith.addf %64, %69 : vector<96x4xf32>
    %c1_75 = arith.constant 1 : index
    %c0_76 = arith.constant 0 : index
    %c0_77 = arith.constant 0 : index
    %71 = vector.load %arg8[%c1_75, %c0_76, %c0_77] : memref<8x18x4xf32, #tpu.memory_space<vmem>>, vector<6x16x4xf32>
    %72 = vector.shape_cast %71 : vector<6x16x4xf32> to vector<96x4xf32>
    %c3 = arith.constant 3 : index
    %c0_78 = arith.constant 0 : index
    %c0_79 = arith.constant 0 : index
    %73 = vector.load %arg3[%c3, %c0_78, %c0_79] : memref<9x4x4xf32, #tpu.memory_space<vmem>>, vector<1x4x4xf32>
    %74 = vector.shape_cast %73 : vector<1x4x4xf32> to vector<4x4xf32>
    %cst_80 = arith.constant dense<0.000000e+00> : vector<96x4xf32>
    %75 = tpu.matmul %72, %74, %cst_80 {dimension_numbers = #tpu.dot_dimension_numbers<[1], [0], [0], [1], [0, 0, 1, 1], [], []>} : vector<96x4xf32>, vector<4x4xf32>, vector<96x4xf32> -> vector<96x4xf32>
    %76 = arith.addf %70, %75 : vector<96x4xf32>
    %c1_81 = arith.constant 1 : index
    %c1_82 = arith.constant 1 : index
    %c0_83 = arith.constant 0 : index
    %77 = vector.load %arg8[%c1_81, %c1_82, %c0_83] : memref<8x18x4xf32, #tpu.memory_space<vmem>>, vector<6x16x4xf32>
    %78 = vector.shape_cast %77 : vector<6x16x4xf32> to vector<96x4xf32>
    %c4 = arith.constant 4 : index
    %c0_84 = arith.constant 0 : index
    %c0_85 = arith.constant 0 : index
    %79 = vector.load %arg3[%c4, %c0_84, %c0_85] : memref<9x4x4xf32, #tpu.memory_space<vmem>>, vector<1x4x4xf32>
    %80 = vector.shape_cast %79 : vector<1x4x4xf32> to vector<4x4xf32>
    %cst_86 = arith.constant dense<0.000000e+00> : vector<96x4xf32>
    %81 = tpu.matmul %78, %80, %cst_86 {dimension_numbers = #tpu.dot_dimension_numbers<[1], [0], [0], [1], [0, 0, 1, 1], [], []>} : vector<96x4xf32>, vector<4x4xf32>, vector<96x4xf32> -> vector<96x4xf32>
    %82 = arith.addf %76, %81 : vector<96x4xf32>
    %c1_87 = arith.constant 1 : index
    %c2_88 = arith.constant 2 : index
    %c0_89 = arith.constant 0 : index
    %83 = vector.load %arg8[%c1_87, %c2_88, %c0_89] : memref<8x18x4xf32, #tpu.memory_space<vmem>>, vector<6x16x4xf32>
    %84 = vector.shape_cast %83 : vector<6x16x4xf32> to vector<96x4xf32>
    %c5 = arith.constant 5 : index
    %c0_90 = arith.constant 0 : index
    %c0_91 = arith.constant 0 : index
    %85 = vector.load %arg3[%c5, %c0_90, %c0_91] : memref<9x4x4xf32, #tpu.memory_space<vmem>>, vector<1x4x4xf32>
    %86 = vector.shape_cast %85 : vector<1x4x4xf32> to vector<4x4xf32>
    %cst_92 = arith.constant dense<0.000000e+00> : vector<96x4xf32>
    %87 = tpu.matmul %84, %86, %cst_92 {dimension_numbers = #tpu.dot_dimension_numbers<[1], [0], [0], [1], [0, 0, 1, 1], [], []>} : vector<96x4xf32>, vector<4x4xf32>, vector<96x4xf32> -> vector<96x4xf32>
    %88 = arith.addf %82, %87 : vector<96x4xf32>
    %c2_93 = arith.constant 2 : index
    %c0_94 = arith.constant 0 : index
    %c0_95 = arith.constant 0 : index
    %89 = vector.load %arg8[%c2_93, %c0_94, %c0_95] : memref<8x18x4xf32, #tpu.memory_space<vmem>>, vector<6x16x4xf32>
    %90 = vector.shape_cast %89 : vector<6x16x4xf32> to vector<96x4xf32>
    %c6_96 = arith.constant 6 : index
    %c0_97 = arith.constant 0 : index
    %c0_98 = arith.constant 0 : index
    %91 = vector.load %arg3[%c6_96, %c0_97, %c0_98] : memref<9x4x4xf32, #tpu.memory_space<vmem>>, vector<1x4x4xf32>
    %92 = vector.shape_cast %91 : vector<1x4x4xf32> to vector<4x4xf32>
    %cst_99 = arith.constant dense<0.000000e+00> : vector<96x4xf32>
    %93 = tpu.matmul %90, %92, %cst_99 {dimension_numbers = #tpu.dot_dimension_numbers<[1], [0], [0], [1], [0, 0, 1, 1], [], []>} : vector<96x4xf32>, vector<4x4xf32>, vector<96x4xf32> -> vector<96x4xf32>
    %94 = arith.addf %88, %93 : vector<96x4xf32>
    %c2_100 = arith.constant 2 : index
    %c1_101 = arith.constant 1 : index
    %c0_102 = arith.constant 0 : index
    %95 = vector.load %arg8[%c2_100, %c1_101, %c0_102] : memref<8x18x4xf32, #tpu.memory_space<vmem>>, vector<6x16x4xf32>
    %96 = vector.shape_cast %95 : vector<6x16x4xf32> to vector<96x4xf32>
    %c7_103 = arith.constant 7 : index
    %c0_104 = arith.constant 0 : index
    %c0_105 = arith.constant 0 : index
    %97 = vector.load %arg3[%c7_103, %c0_104, %c0_105] : memref<9x4x4xf32, #tpu.memory_space<vmem>>, vector<1x4x4xf32>
    %98 = vector.shape_cast %97 : vector<1x4x4xf32> to vector<4x4xf32>
    %cst_106 = arith.constant dense<0.000000e+00> : vector<96x4xf32>
    %99 = tpu.matmul %96, %98, %cst_106 {dimension_numbers = #tpu.dot_dimension_numbers<[1], [0], [0], [1], [0, 0, 1, 1], [], []>} : vector<96x4xf32>, vector<4x4xf32>, vector<96x4xf32> -> vector<96x4xf32>
    %100 = arith.addf %94, %99 : vector<96x4xf32>
    %c2_107 = arith.constant 2 : index
    %c2_108 = arith.constant 2 : index
    %c0_109 = arith.constant 0 : index
    %101 = vector.load %arg8[%c2_107, %c2_108, %c0_109] : memref<8x18x4xf32, #tpu.memory_space<vmem>>, vector<6x16x4xf32>
    %102 = vector.shape_cast %101 : vector<6x16x4xf32> to vector<96x4xf32>
    %c8 = arith.constant 8 : index
    %c0_110 = arith.constant 0 : index
    %c0_111 = arith.constant 0 : index
    %103 = vector.load %arg3[%c8, %c0_110, %c0_111] : memref<9x4x4xf32, #tpu.memory_space<vmem>>, vector<1x4x4xf32>
    %104 = vector.shape_cast %103 : vector<1x4x4xf32> to vector<4x4xf32>
    %cst_112 = arith.constant dense<0.000000e+00> : vector<96x4xf32>
    %105 = tpu.matmul %102, %104, %cst_112 {dimension_numbers = #tpu.dot_dimension_numbers<[1], [0], [0], [1], [0, 0, 1, 1], [], []>} : vector<96x4xf32>, vector<4x4xf32>, vector<96x4xf32> -> vector<96x4xf32>
    %106 = arith.addf %100, %105 : vector<96x4xf32>
    %c0_113 = arith.constant 0 : index
    %c0_114 = arith.constant 0 : index
    %107 = vector.load %arg4[%c0_113, %c0_114] : memref<1x4xf32, #tpu.memory_space<vmem>>, vector<1x4xf32>
    %108 = vector.broadcast %107 : vector<1x4xf32> to vector<96x4xf32>
    %109 = arith.addf %106, %108 : vector<96x4xf32>
    %cst_115 = arith.constant 0.000000e+00 : f32
    %110 = vector.broadcast %cst_115 : f32 to vector<96x4xf32>
    %111 = arith.maximumf %109, %110 : vector<96x4xf32>
    %112 = vector.shape_cast %111 : vector<96x4xf32> to vector<6x16x4xf32>
    %c0_116 = arith.constant 0 : index
    %c1_117 = arith.constant 1 : index
    %c0_118 = arith.constant 0 : index
    %113 = vector.load %arg9[%c0_116, %c1_117, %c0_118] : memref<6x18x4xf32, #tpu.memory_space<vmem>>, vector<6x16x4xf32>
    tpu.vector_store %arg9[%c0_116, %c1_117, %c0_118], %112 {strides = array<i32>} : memref<6x18x4xf32, #tpu.memory_space<vmem>>, vector<6x16x4xf32>,
    %c0_i32_119 = arith.constant 0 : i32
    %114 = arith.cmpi eq, %arg1, %c0_i32_119 : i32
    %115 = arith.extui %114 : i1 to i32
    %c0_i32_120 = arith.constant 0 : i32
    %116 = arith.cmpi ne, %115, %c0_i32_120 : i32
    scf.if %116 {
      %c2_206 = arith.constant 2 : index
      %c1_207 = arith.constant 1 : index
      %c0_208 = arith.constant 0 : index
      %188 = vector.load %arg9[%c2_206, %c1_207, %c0_208] : memref<6x18x4xf32, #tpu.memory_space<vmem>>, vector<1x16x4xf32>
      %c0_209 = arith.constant 0 : index
      %c1_210 = arith.constant 1 : index
      %c0_211 = arith.constant 0 : index
      %189 = vector.load %arg9[%c0_209, %c1_210, %c0_211] : memref<6x18x4xf32, #tpu.memory_space<vmem>>, vector<1x16x4xf32>
      tpu.vector_store %arg9[%c0_209, %c1_210, %c0_211], %188 {strides = array<i32>} : memref<6x18x4xf32, #tpu.memory_space<vmem>>, vector<1x16x4xf32>,
    } else {
    }
    %c3_i32 = arith.constant 3 : i32
    %117 = arith.cmpi eq, %arg1, %c3_i32 : i32
    %118 = arith.extui %117 : i1 to i32
    %c0_i32_121 = arith.constant 0 : i32
    %119 = arith.cmpi ne, %118, %c0_i32_121 : i32
    scf.if %119 {
      %c3_206 = arith.constant 3 : index
      %c1_207 = arith.constant 1 : index
      %c0_208 = arith.constant 0 : index
      %188 = vector.load %arg9[%c3_206, %c1_207, %c0_208] : memref<6x18x4xf32, #tpu.memory_space<vmem>>, vector<1x16x4xf32>
      %c5_209 = arith.constant 5 : index
      %c1_210 = arith.constant 1 : index
      %c0_211 = arith.constant 0 : index
      %189 = vector.load %arg9[%c5_209, %c1_210, %c0_211] : memref<6x18x4xf32, #tpu.memory_space<vmem>>, vector<1x16x4xf32>
      tpu.vector_store %arg9[%c5_209, %c1_210, %c0_211], %188 {strides = array<i32>} : memref<6x18x4xf32, #tpu.memory_space<vmem>>, vector<1x16x4xf32>,
    } else {
    }
    %c0_122 = arith.constant 0 : index
    %c2_123 = arith.constant 2 : index
    %c0_124 = arith.constant 0 : index
    %120 = vector.load %arg9[%c0_122, %c2_123, %c0_124] : memref<6x18x4xf32, #tpu.memory_space<vmem>>, vector<6x1x4xf32>
    %c0_125 = arith.constant 0 : index
    %c0_126 = arith.constant 0 : index
    %c0_127 = arith.constant 0 : index
    %121 = vector.load %arg9[%c0_125, %c0_126, %c0_127] : memref<6x18x4xf32, #tpu.memory_space<vmem>>, vector<6x1x4xf32>
    tpu.vector_store %arg9[%c0_125, %c0_126, %c0_127], %120 {strides = array<i32>} : memref<6x18x4xf32, #tpu.memory_space<vmem>>, vector<6x1x4xf32>,
    %c0_128 = arith.constant 0 : index
    %c15_129 = arith.constant 15 : index
    %c0_130 = arith.constant 0 : index
    %122 = vector.load %arg9[%c0_128, %c15_129, %c0_130] : memref<6x18x4xf32, #tpu.memory_space<vmem>>, vector<6x1x4xf32>
    %c0_131 = arith.constant 0 : index
    %c17_132 = arith.constant 17 : index
    %c0_133 = arith.constant 0 : index
    %123 = vector.load %arg9[%c0_131, %c17_132, %c0_133] : memref<6x18x4xf32, #tpu.memory_space<vmem>>, vector<6x1x4xf32>
    tpu.vector_store %arg9[%c0_131, %c17_132, %c0_133], %122 {strides = array<i32>} : memref<6x18x4xf32, #tpu.memory_space<vmem>>, vector<6x1x4xf32>,
    %c0_134 = arith.constant 0 : index
    %c0_135 = arith.constant 0 : index
    %c0_136 = arith.constant 0 : index
    %124 = vector.load %arg9[%c0_134, %c0_135, %c0_136] : memref<6x18x4xf32, #tpu.memory_space<vmem>>, vector<4x16x4xf32>
    %125 = vector.shape_cast %124 : vector<4x16x4xf32> to vector<64x4xf32>
    %c0_137 = arith.constant 0 : index
    %c0_138 = arith.constant 0 : index
    %c0_139 = arith.constant 0 : index
    %126 = vector.load %arg5[%c0_137, %c0_138, %c0_139] : memref<9x4x4xf32, #tpu.memory_space<vmem>>, vector<1x4x4xf32>
    %127 = vector.shape_cast %126 : vector<1x4x4xf32> to vector<4x4xf32>
    %cst_140 = arith.constant dense<0.000000e+00> : vector<64x4xf32>
    %128 = tpu.matmul %125, %127, %cst_140 {dimension_numbers = #tpu.dot_dimension_numbers<[1], [0], [0], [1], [0, 0, 1, 1], [], []>} : vector<64x4xf32>, vector<4x4xf32>, vector<64x4xf32> -> vector<64x4xf32>
    %c0_141 = arith.constant 0 : index
    %c1_142 = arith.constant 1 : index
    %c0_143 = arith.constant 0 : index
    %129 = vector.load %arg9[%c0_141, %c1_142, %c0_143] : memref<6x18x4xf32, #tpu.memory_space<vmem>>, vector<4x16x4xf32>
    %130 = vector.shape_cast %129 : vector<4x16x4xf32> to vector<64x4xf32>
    %c1_144 = arith.constant 1 : index
    %c0_145 = arith.constant 0 : index
    %c0_146 = arith.constant 0 : index
    %131 = vector.load %arg5[%c1_144, %c0_145, %c0_146] : memref<9x4x4xf32, #tpu.memory_space<vmem>>, vector<1x4x4xf32>
    %132 = vector.shape_cast %131 : vector<1x4x4xf32> to vector<4x4xf32>
    %cst_147 = arith.constant dense<0.000000e+00> : vector<64x4xf32>
    %133 = tpu.matmul %130, %132, %cst_147 {dimension_numbers = #tpu.dot_dimension_numbers<[1], [0], [0], [1], [0, 0, 1, 1], [], []>} : vector<64x4xf32>, vector<4x4xf32>, vector<64x4xf32> -> vector<64x4xf32>
    %134 = arith.addf %128, %133 : vector<64x4xf32>
    %c0_148 = arith.constant 0 : index
    %c2_149 = arith.constant 2 : index
    %c0_150 = arith.constant 0 : index
    %135 = vector.load %arg9[%c0_148, %c2_149, %c0_150] : memref<6x18x4xf32, #tpu.memory_space<vmem>>, vector<4x16x4xf32>
    %136 = vector.shape_cast %135 : vector<4x16x4xf32> to vector<64x4xf32>
    %c2_151 = arith.constant 2 : index
    %c0_152 = arith.constant 0 : index
    %c0_153 = arith.constant 0 : index
    %137 = vector.load %arg5[%c2_151, %c0_152, %c0_153] : memref<9x4x4xf32, #tpu.memory_space<vmem>>, vector<1x4x4xf32>
    %138 = vector.shape_cast %137 : vector<1x4x4xf32> to vector<4x4xf32>
    %cst_154 = arith.constant dense<0.000000e+00> : vector<64x4xf32>
    %139 = tpu.matmul %136, %138, %cst_154 {dimension_numbers = #tpu.dot_dimension_numbers<[1], [0], [0], [1], [0, 0, 1, 1], [], []>} : vector<64x4xf32>, vector<4x4xf32>, vector<64x4xf32> -> vector<64x4xf32>
    %140 = arith.addf %134, %139 : vector<64x4xf32>
    %c1_155 = arith.constant 1 : index
    %c0_156 = arith.constant 0 : index
    %c0_157 = arith.constant 0 : index
    %141 = vector.load %arg9[%c1_155, %c0_156, %c0_157] : memref<6x18x4xf32, #tpu.memory_space<vmem>>, vector<4x16x4xf32>
    %142 = vector.shape_cast %141 : vector<4x16x4xf32> to vector<64x4xf32>
    %c3_158 = arith.constant 3 : index
    %c0_159 = arith.constant 0 : index
    %c0_160 = arith.constant 0 : index
    %143 = vector.load %arg5[%c3_158, %c0_159, %c0_160] : memref<9x4x4xf32, #tpu.memory_space<vmem>>, vector<1x4x4xf32>
    %144 = vector.shape_cast %143 : vector<1x4x4xf32> to vector<4x4xf32>
    %cst_161 = arith.constant dense<0.000000e+00> : vector<64x4xf32>
    %145 = tpu.matmul %142, %144, %cst_161 {dimension_numbers = #tpu.dot_dimension_numbers<[1], [0], [0], [1], [0, 0, 1, 1], [], []>} : vector<64x4xf32>, vector<4x4xf32>, vector<64x4xf32> -> vector<64x4xf32>
    %146 = arith.addf %140, %145 : vector<64x4xf32>
    %c1_162 = arith.constant 1 : index
    %c1_163 = arith.constant 1 : index
    %c0_164 = arith.constant 0 : index
    %147 = vector.load %arg9[%c1_162, %c1_163, %c0_164] : memref<6x18x4xf32, #tpu.memory_space<vmem>>, vector<4x16x4xf32>
    %148 = vector.shape_cast %147 : vector<4x16x4xf32> to vector<64x4xf32>
    %c4_165 = arith.constant 4 : index
    %c0_166 = arith.constant 0 : index
    %c0_167 = arith.constant 0 : index
    %149 = vector.load %arg5[%c4_165, %c0_166, %c0_167] : memref<9x4x4xf32, #tpu.memory_space<vmem>>, vector<1x4x4xf32>
    %150 = vector.shape_cast %149 : vector<1x4x4xf32> to vector<4x4xf32>
    %cst_168 = arith.constant dense<0.000000e+00> : vector<64x4xf32>
    %151 = tpu.matmul %148, %150, %cst_168 {dimension_numbers = #tpu.dot_dimension_numbers<[1], [0], [0], [1], [0, 0, 1, 1], [], []>} : vector<64x4xf32>, vector<4x4xf32>, vector<64x4xf32> -> vector<64x4xf32>
    %152 = arith.addf %146, %151 : vector<64x4xf32>
    %c1_169 = arith.constant 1 : index
    %c2_170 = arith.constant 2 : index
    %c0_171 = arith.constant 0 : index
    %153 = vector.load %arg9[%c1_169, %c2_170, %c0_171] : memref<6x18x4xf32, #tpu.memory_space<vmem>>, vector<4x16x4xf32>
    %154 = vector.shape_cast %153 : vector<4x16x4xf32> to vector<64x4xf32>
    %c5_172 = arith.constant 5 : index
    %c0_173 = arith.constant 0 : index
    %c0_174 = arith.constant 0 : index
    %155 = vector.load %arg5[%c5_172, %c0_173, %c0_174] : memref<9x4x4xf32, #tpu.memory_space<vmem>>, vector<1x4x4xf32>
    %156 = vector.shape_cast %155 : vector<1x4x4xf32> to vector<4x4xf32>
    %cst_175 = arith.constant dense<0.000000e+00> : vector<64x4xf32>
    %157 = tpu.matmul %154, %156, %cst_175 {dimension_numbers = #tpu.dot_dimension_numbers<[1], [0], [0], [1], [0, 0, 1, 1], [], []>} : vector<64x4xf32>, vector<4x4xf32>, vector<64x4xf32> -> vector<64x4xf32>
    %158 = arith.addf %152, %157 : vector<64x4xf32>
    %c2_176 = arith.constant 2 : index
    %c0_177 = arith.constant 0 : index
    %c0_178 = arith.constant 0 : index
    %159 = vector.load %arg9[%c2_176, %c0_177, %c0_178] : memref<6x18x4xf32, #tpu.memory_space<vmem>>, vector<4x16x4xf32>
    %160 = vector.shape_cast %159 : vector<4x16x4xf32> to vector<64x4xf32>
    %c6_179 = arith.constant 6 : index
    %c0_180 = arith.constant 0 : index
    %c0_181 = arith.constant 0 : index
    %161 = vector.load %arg5[%c6_179, %c0_180, %c0_181] : memref<9x4x4xf32, #tpu.memory_space<vmem>>, vector<1x4x4xf32>
    %162 = vector.shape_cast %161 : vector<1x4x4xf32> to vector<4x4xf32>
    %cst_182 = arith.constant dense<0.000000e+00> : vector<64x4xf32>
    %163 = tpu.matmul %160, %162, %cst_182 {dimension_numbers = #tpu.dot_dimension_numbers<[1], [0], [0], [1], [0, 0, 1, 1], [], []>} : vector<64x4xf32>, vector<4x4xf32>, vector<64x4xf32> -> vector<64x4xf32>
    %164 = arith.addf %158, %163 : vector<64x4xf32>
    %c2_183 = arith.constant 2 : index
    %c1_184 = arith.constant 1 : index
    %c0_185 = arith.constant 0 : index
    %165 = vector.load %arg9[%c2_183, %c1_184, %c0_185] : memref<6x18x4xf32, #tpu.memory_space<vmem>>, vector<4x16x4xf32>
    %166 = vector.shape_cast %165 : vector<4x16x4xf32> to vector<64x4xf32>
    %c7_186 = arith.constant 7 : index
    %c0_187 = arith.constant 0 : index
    %c0_188 = arith.constant 0 : index
    %167 = vector.load %arg5[%c7_186, %c0_187, %c0_188] : memref<9x4x4xf32, #tpu.memory_space<vmem>>, vector<1x4x4xf32>
    %168 = vector.shape_cast %167 : vector<1x4x4xf32> to vector<4x4xf32>
    %cst_189 = arith.constant dense<0.000000e+00> : vector<64x4xf32>
    %169 = tpu.matmul %166, %168, %cst_189 {dimension_numbers = #tpu.dot_dimension_numbers<[1], [0], [0], [1], [0, 0, 1, 1], [], []>} : vector<64x4xf32>, vector<4x4xf32>, vector<64x4xf32> -> vector<64x4xf32>
    %170 = arith.addf %164, %169 : vector<64x4xf32>
    %c2_190 = arith.constant 2 : index
    %c2_191 = arith.constant 2 : index
    %c0_192 = arith.constant 0 : index
    %171 = vector.load %arg9[%c2_190, %c2_191, %c0_192] : memref<6x18x4xf32, #tpu.memory_space<vmem>>, vector<4x16x4xf32>
    %172 = vector.shape_cast %171 : vector<4x16x4xf32> to vector<64x4xf32>
    %c8_193 = arith.constant 8 : index
    %c0_194 = arith.constant 0 : index
    %c0_195 = arith.constant 0 : index
    %173 = vector.load %arg5[%c8_193, %c0_194, %c0_195] : memref<9x4x4xf32, #tpu.memory_space<vmem>>, vector<1x4x4xf32>
    %174 = vector.shape_cast %173 : vector<1x4x4xf32> to vector<4x4xf32>
    %cst_196 = arith.constant dense<0.000000e+00> : vector<64x4xf32>
    %175 = tpu.matmul %172, %174, %cst_196 {dimension_numbers = #tpu.dot_dimension_numbers<[1], [0], [0], [1], [0, 0, 1, 1], [], []>} : vector<64x4xf32>, vector<4x4xf32>, vector<64x4xf32> -> vector<64x4xf32>
    %176 = arith.addf %170, %175 : vector<64x4xf32>
    %c0_197 = arith.constant 0 : index
    %c0_198 = arith.constant 0 : index
    %177 = vector.load %arg6[%c0_197, %c0_198] : memref<1x4xf32, #tpu.memory_space<vmem>>, vector<1x4xf32>
    %178 = vector.broadcast %177 : vector<1x4xf32> to vector<64x4xf32>
    %179 = arith.addf %176, %178 : vector<64x4xf32>
    %180 = vector.shape_cast %179 : vector<64x4xf32> to vector<4x16x4xf32>
    %c0_199 = arith.constant 0 : index
    %181 = arith.index_cast %1 : i32 to index
    %c0_200 = arith.constant 0 : index
    %c0_201 = arith.constant 0 : index
    %182 = vector.load %arg2[%c0_199, %181, %c0_200, %c0_201] : memref<1x16x16x4xf32, #tpu.memory_space<vmem>>, vector<1x4x16x4xf32>
    %183 = vector.shape_cast %182 : vector<1x4x16x4xf32> to vector<4x16x4xf32>
    %184 = arith.addf %180, %183 : vector<4x16x4xf32>
    %c0_202 = arith.constant 0 : index
    %c0_203 = arith.constant 0 : index
    %c0_204 = arith.constant 0 : index
    %c0_205 = arith.constant 0 : index
    %185 = vector.load %arg7[%c0_202, %c0_203, %c0_204, %c0_205] : memref<1x4x16x4xf32, #tpu.memory_space<vmem>>, vector<1x4x16x4xf32>
    %186 = vector.shape_cast %185 : vector<1x4x16x4xf32> to vector<4x16x4xf32>
    %187 = vector.shape_cast %184 : vector<4x16x4xf32> to vector<1x4x16x4xf32>
    tpu.vector_store %arg7[%c0_202, %c0_203, %c0_204, %c0_205], %187 {strides = array<i32>} : memref<1x4x16x4xf32, #tpu.memory_space<vmem>>, vector<1x4x16x4xf32>,
    return
  }
  func.func @transform_0(%arg0: i32, %arg1: i32) -> (i32, i32, i32, i32) {
    %c0_i32 = arith.constant 0 : i32
    %c0_i32_0 = arith.constant 0 : i32
    %c0_i32_1 = arith.constant 0 : i32
    %c0_i32_2 = arith.constant 0 : i32
    return %arg0, %c0_i32, %c0_i32_0, %c0_i32_1 : i32, i32, i32, i32
  }
  func.func @transform_1(%arg0: i32, %arg1: i32) -> (i32, i32, i32) {
    %c0_i32 = arith.constant 0 : i32
    %c0_i32_0 = arith.constant 0 : i32
    %c0_i32_1 = arith.constant 0 : i32
    %c0_i32_2 = arith.constant 0 : i32
    return %c0_i32, %c0_i32_0, %c0_i32_1 : i32, i32, i32
  }
  func.func @transform_2(%arg0: i32, %arg1: i32) -> (i32, i32) {
    %c0_i32 = arith.constant 0 : i32
    %c0_i32_0 = arith.constant 0 : i32
    %c0_i32_1 = arith.constant 0 : i32
    return %c0_i32, %c0_i32_0 : i32, i32
  }
  func.func @transform_3(%arg0: i32, %arg1: i32) -> (i32, i32, i32) {
    %c0_i32 = arith.constant 0 : i32
    %c0_i32_0 = arith.constant 0 : i32
    %c0_i32_1 = arith.constant 0 : i32
    %c0_i32_2 = arith.constant 0 : i32
    return %c0_i32, %c0_i32_0, %c0_i32_1 : i32, i32, i32
  }
  func.func @transform_4(%arg0: i32, %arg1: i32) -> (i32, i32) {
    %c0_i32 = arith.constant 0 : i32
    %c0_i32_0 = arith.constant 0 : i32
    %c0_i32_1 = arith.constant 0 : i32
    return %c0_i32, %c0_i32_0 : i32, i32
  }
  func.func @transform_5(%arg0: i32, %arg1: i32) -> (i32, i32, i32, i32) {
    %c0_i32 = arith.constant 0 : i32
    %c0_i32_0 = arith.constant 0 : i32
    %c0_i32_1 = arith.constant 0 : i32
    return %arg0, %arg1, %c0_i32, %c0_i32_0 : i32, i32, i32, i32
  }
}

</mosaic_0001>

<bundles_post_ra>
// kernel: tpu_custom_call.1
= control target key start
LH: loop header
LB: loop body
LE: loop exit
PB: predicated region body
PF: predicated region fallthrough
CT: control target
= control target key end

     0   :  { %s2763_s18 = smov 0   ;;  %s2765_s19 = smov 0   ;;  %s3486_s0 = inlined_call_operand.vmem [shape: f32[2,16,16,4], index: 0, kind: input, shape index: {}]   ;;  %s3487_s1 = inlined_call_operand.vmem [shape: f32[9,4,4], index: 1, kind: input, shape index: {}]   ;;  %s3488_s2 = inlined_call_operand.vmem [shape: f32[1,4], index: 2, kind: input, shape index: {}]   ;;  %s3489_s3 = inlined_call_operand.vmem [shape: f32[9,4,4], index: 3, kind: input, shape index: {}]   ;;  %s3490_s4 = inlined_call_operand.vmem [shape: f32[1,4], index: 4, kind: input, shape index: {}]   ;;  %s3491_s5 = inlined_call_operand.vmem [shape: f32[2,16,16,4], index: 5, kind: output, shape index: {}]  }
   0x1   :  { %s2767_s20 = smov 0   ;;  %s2769_s21 = smov 0  }
   0x2   :  { %s2771_s22 = smov 0  }
   0x3 LB: > { %s24_s23 = sadd.s32 1, %s2723_s20  ;;  %s27_s24 = sadd.s32 1, %s2727_s21  ;;  %s2731_s22 = sphi %s2771_s22, %s15_s22   ;;  %s2727_s21 = sphi %s2769_s21, %s3495_s21   ;;  %s2723_s20 = sphi %s2767_s20, %s3494_s20   ;;  %s2719_s19 = sphi %s2765_s19, %s3493_s19   ;;  %s2715_s18 = sphi %s2763_s18, %s3492_s18  }
   0x4   : > { %p25_p0 = scmp.ge.s32.totalorder %s24_s23, 4  ;;  %p2387_p1 = scmp.ge.s32.totalorder %s2731_s22, 1 }
   0x5   : > { %p201_p2 = scmp.lt.s32.totalorder %s2731_s22, 9 }
   0x6   : > { %s3497_s23 = smov (%p25_p0, %s24_s23), 0  ;;  %s3499_s24 = smov (!%p25_p0, %s27_s24), %s2727_s21 }
   0x7   : > { %p202_p3 = pnand %p2387_p1, %p201_p2  ;;  %p29_p4 = scmp.ge.s32.totalorder %s3499_s24, 2 }
   0x8   : > { %p234_p5 = scmp.lt.s32.totalorder (!%p202_p3), %s2719_s19, 1  ;;  %s2639_s27 = sshll.u32 (!%p202_p3), %s2715_s18, 6 }
   0x9   : > { %s3501_s24 = smov (%p29_p4, %s3499_s24), 0  ;;  %205 = sbr.rel (%p202_p3) target bundleno = 806 (0x326), region = 40 }
   0xa   : > { %s2807_s7 = sshll.u32 (!%p202_p3), %s2715_s18, 2 }
   0xb   : > { %p242_p6 = scmp.lt.s32.totalorder (!%p202_p3), %s2807_s7, 15  ;;  %s271_s8 = sadd.s32 (!%p202_p3), 4294967294, %s2807_s7 }
   0xc   : > { %p272_p7 = scmp.eq.s32.totalorder (!%p202_p3), %s271_s8, 4294967295  ;;  %s286_s15 = sadd.s32 (!%p202_p3), 4294967295, %s2807_s7 }
   0xd   : > { %p287_p8 = scmp.eq.s32.totalorder (!%p202_p3), %s286_s15, 4294967295  ;;  %s302_s11 = sadd.s32 (!%p202_p3), 4, %s2807_s7 }
   0xe   : > { %v379_v0 = vld [vmem:[%s3487_s1] sm:$0xf]  ;;  %vm430_vm0 = vcmask 1043456   ;;  %v2420_v1 = vld [vmem:[%s3487_s1 + $0x4] sm:$0xf]  ;;  %s3503_s19 = smov (!%p234_p5, %s2719_s19), 1 }
   0xf   : > { %2649 = vmatpush.msk.msra.mxu3 %vm430_vm0, %v379_v0  ;;  %v2447_v2 = vld [vmem:[%s3487_s1 + $0x8] sm:$0xf]  ;;  %2648 = vmatpush.msk.msra.mxu1 %vm430_vm0, %v379_v0  ;;  %s2638_s9 = sshll.u32 %s3503_s19, 8  ;;  %s2392_s10 = sshll.u32 %s3503_s19, 5  ;;  %vm262_vm1 = vcmask 31744   ;;  %vm342_vm2 = vcmask 24576  }
  0x10   : > { %2421 = vmatpush.msk.msra.mxu0 %vm430_vm0, %v2420_v1  ;;  %2448 = vmatpush.msk.msra.mxu2 %vm430_vm0, %v2447_v2  ;;  %s2819_s13 = scalar_lea.vmem %s3486_s0, %s2638_s9  ;;  %s3505_s8 = smov (%p272_p7, %s271_s8), 1  ;;  %v2461_v23 = vld [vmem:[%s3487_s1 + $0xc] sm:$0xf]  ;;  %v2475_v59 = vld [vmem:[%s3487_s1 + $0x10] sm:$0xf] }
  0x11   : > { %2650 = vmatpush.msk.msrb.mxu3 %vm430_vm0, %v2447_v2  ;;  %s2822_s14 = scalar_lea.vmem %s2819_s13, %s2639_s27  ;;  %p274_p9 = scmp.eq.s32.totalorder %s3505_s8, 16  ;;  %v2517_v60 = vld [vmem:[%s3487_s1 + $0x1c] sm:$0xf]  ;;  %v2503_v61 = vld [vmem:[%s3487_s1 + $0x18] sm:$0xf] }
  0x12   : > { %2434 = vmatpush.msk.msrb.mxu0 %vm430_vm0, %v379_v0  ;;  %v259_v3 = vld [vmem:[%s2822_s14 + $0x30] sm:$0xff]  ;;  %s243_s16 = scalar_select %p242_p6, %s2807_s7, 15  ;;  %v260_v4 = vld [vmem:[%s2822_s14 + $0x38] sm:$0xff]  ;;  %v258_v5 = vld [vmem:[%s2822_s14 + $0x28] sm:$0xff]  ;;  %2504 = vmatpush.msk.msrb.mxu2 %vm430_vm0, %v2503_v61 }
  0x13   : > { %269 = vst.msk [vmem:[#allocation2 + $0x79] sm:$0xff] %vm262_vm1, %v259_v3  ;;  %s3507_s8 = smov (%p274_p9, %s3505_s8), 14  ;;  %s3509_s15 = smov (%p287_p8, %s286_s15), 1  ;;  %v253_v8 = vld [vmem:[%s2822_s14] sm:$0xff]  ;;  %v254_v13 = vld [vmem:[%s2822_s14 + $0x8] sm:$0xff]  ;;  %v255_v24 = vld [vmem:[%s2822_s14 + $0x10] sm:$0xff] }
  0x14   : > { %s2391_s17 = sshll.u32 %s243_s16, 1  ;;  %270 = vst.msk [vmem:[#allocation2 + $0x81] sm:$0xff] %vm262_vm1, %v260_v4  ;;  %p276_p10 = scmp.gt.s32.totalorder %s3507_s8, 0  ;;  %v256_v30 = vld [vmem:[%s2822_s14 + $0x18] sm:$0xff]  ;;  %v257_v37 = vld [vmem:[%s2822_s14 + $0x20] sm:$0xff] }
  0x15   : > { %s246_s19 = sadd.s32 %s2392_s10, %s2391_s17  ;;  %268 = vst.msk [vmem:[#allocation2 + $0x69] sm:$0xff] %vm262_vm1, %v258_v5  ;;  %p2396_p11 = scmp.lt.s32.totalorder %s3507_s8, 15  ;;  %v2489_v1 = vld [vmem:[%s3487_s1 + $0x14] sm:$0xf] }
  0x16   : > { %s2393_s25 = sshll.u32 %s246_s19, 3  ;;  %p289_p12 = scmp.eq.s32.totalorder %s3509_s15, 16  ;;  %263 = vst.msk [vmem:[#allocation2 + $0x31] sm:$0xff] %vm262_vm1, %v253_v8  ;;  %2490 = vmatpush.msk.msrb.mxu1 %vm430_vm0, %v2489_v1 }
  0x17   : > { %s2835_s28 = scalar_lea.vmem %s3491_s5, %s2393_s25  ;;  %s3511_s8 = smov (!%p276_p10, %s3507_s8), 0  ;;  %264 = vst.msk [vmem:[#allocation2 + $0x39] sm:$0xff] %vm262_vm1, %v254_v13 }
  0x18   : > { %s3513_s15 = smov (%p289_p12, %s3509_s15), 14  ;;  %s3515_s8 = smov (!%p2396_p11, %s3511_s8), 15  ;;  %265 = vst.msk [vmem:[#allocation2 + $0x49] sm:$0xff] %vm262_vm1, %v255_v24 }
  0x19   : > { %p291_p13 = scmp.gt.s32.totalorder %s3513_s15, 0  ;;  %s2401_s29 = sshll.u32 %s3515_s8, 4  ;;  %266 = vst.msk [vmem:[#allocation2 + $0x51] sm:$0xff] %vm262_vm1, %v256_v30 }
  0x1a   : > { %v339_v6 = vld [vmem:[#allocation2 + $0x7a] sm:$0x1]  ;;  %p2402_p0 = scmp.lt.s32.totalorder %s3513_s15, 15  ;;  %s281_s30 = scalar_lea.vmem %s2819_s13, %s2401_s29  ;;  %267 = vst.msk [vmem:[#allocation2 + $0x61] sm:$0xff] %vm262_vm1, %v257_v37 }
  0x1b   : > { %348 = vst.msk [vmem:[#allocation2 + $0x78] sm:$0x1] %vm342_vm2, %v339_v6  ;;  %v356_v9 = vld [vmem:[#allocation2 + $0x87] sm:$0x1]  ;;  %v283_v12 = vld [vmem:[%s281_s30 + $0x8] sm:$0xff]  ;;  %s3517_s15 = smov (!%p291_p13, %s3513_s15), 0 }
  0x1c   : > { %v355_v7 = vld [vmem:[#allocation2 + $0x6f] sm:$0x1]  ;;  %v282_v11 = vld [vmem:[%s281_s30] sm:$0xff]  ;;  %364 = vst.msk [vmem:[#allocation2 + $0x89] sm:$0x1] %vm342_vm2, %v356_v9  ;;  %s3519_s15 = smov (!%p2402_p0, %s3517_s15), 15 }
  0x1d   : > { %363 = vst.msk [vmem:[#allocation2 + $0x71] sm:$0x1] %vm342_vm2, %v355_v7  ;;  %v336_v14 = vld [vmem:[#allocation2 + $0x32] sm:$0x1]  ;;  %s2407_s6 = sshll.u32 %s3519_s15, 4  ;;  %v2853_v15 = vld [vmem:[#allocation2 + $0x80] sm:$0xff] }
  0x1e   : > { %284 = vst.msk [vmem:[#allocation2 + $0x1] sm:$0xff] %vm262_vm1, %v282_v11  ;;  %s296_s8 = scalar_lea.vmem %s2819_s13, %s2407_s6  ;;  %v353_v22 = vld [vmem:[#allocation2 + $0x3f] sm:$0x1]  ;;  %v2913_v44 = vld [vmem:[#allocation2 + $0x31] sm:$0xff]  ;;  %p303_p1 = scmp.eq.s32.totalorder %s302_s11, 4294967295  ;;  %v2980_v63 = vld [vmem:[#allocation2 + $0x69] sm:$0xff] }
  0x1f   : > { %285 = vst.msk [vmem:[#allocation2 + $0x9] sm:$0xff] %vm262_vm1, %v283_v12  ;;  %v297_v16 = vld [vmem:[%s296_s8] sm:$0xff]  ;;  %v298_v17 = vld [vmem:[%s296_s8 + $0x8] sm:$0xff]  ;;  %v2917_v45 = vld [vmem:[#allocation2 + $0x32] sm:$0xff]  ;;  %s318_s9 = sadd.s32 5, %s2807_s7  ;;  %p2545_p9 = scmp.ne.s32.totalorder %s2715_s18, 0 }
  0x20   : > { %345 = vst.msk [vmem:[#allocation2 + $0x30] sm:$0x1] %vm342_vm2, %v336_v14  ;;  %v337_v31 = vld [vmem:[#allocation2 + $0x4a] sm:$0x1]  ;;  %v2883_v34 = vld [vmem:[#allocation2 + $0x7a] sm:$0xff]  ;;  %s3521_s11 = smov (%p303_p1, %s302_s11), 1 }
  0x21   : > { %300 = vst.msk [vmem:[#allocation2 + $0x19] sm:$0xff] %vm262_vm1, %v297_v16  ;;  %v354_v36 = vld [vmem:[#allocation2 + $0x57] sm:$0x1]  ;;  %v338_v42 = vld [vmem:[#allocation2 + $0x62] sm:$0x1]  ;;  %v372_v46 = vld [vmem:[#allocation2 + $0x38] sm:$0xff] }
  0x22   : > { %v2842_v10 = vld [vmem:[#allocation2 + $0x78] sm:$0xff]  ;;  %301 = vst.msk [vmem:[#allocation2 + $0x21] sm:$0xff] %vm262_vm1, %v298_v17  ;;  %p305_p2 = scmp.eq.s32.totalorder %s3521_s11, 16  ;;  %v2935_v50 = vld [vmem:[#allocation2 + $0x49] sm:$0xff]  ;;  %v2957_v57 = vld [vmem:[#allocation2 + $0x61] sm:$0xff]  ;;  %p319_p5 = scmp.eq.s32.totalorder %s318_s9, 4294967295 }
  0x23   : > { %2445 = vmatmul.msk.f32.vlgmr.msra.gmra.mxu3 %vm262_vm1, %v2842_v10  ;;  %361 = vst.msk [vmem:[#allocation2 + $0x41] sm:$0x1] %vm342_vm2, %v353_v22  ;;  %v2899_v40 = vld [vmem:[#allocation2 + $0x82] sm:$0xff]  ;;  %v2925_v47 = vld [vmem:[#allocation2 + $0x39] sm:$0xff]  ;;  %v2938_v51 = vld [vmem:[#allocation2 + $0x4a] sm:$0xff] }
  0x24   : > { %2462 = vmatpush.msk.msra.mxu3 %vm430_vm0, %v2461_v23  ;;  %v2870_v26 = vld [vmem:[#allocation2 + $0x6a] sm:$0xff]  ;;  %346 = vst.msk [vmem:[#allocation2 + $0x48] sm:$0x1] %vm342_vm2, %v337_v31  ;;  %s3523_s11 = smov (%p305_p2, %s3521_s11), 14  ;;  %v2960_v58 = vld [vmem:[#allocation2 + $0x62] sm:$0xff]  ;;  %v2993_v2 = vld [vmem:[#allocation2 + $0x79] sm:$0xff] }
  0x25   : > { %v380_v18 = vld [vmem:[#allocation2 + $0x1] sm:$0xff]  ;;  %362 = vst.msk [vmem:[#allocation2 + $0x59] sm:$0x1] %vm342_vm2, %v354_v36  ;;  %v374_v52 = vld [vmem:[#allocation2 + $0x50] sm:$0xff]  ;;  %p307_p3 = scmp.gt.s32.totalorder %s3523_s11, 0  ;;  %p2408_p4 = scmp.lt.s32.totalorder %s3523_s11, 15 }
  0x26   : > { %2422 = vmatmul.msk.f32.vlgmr.msra.gmra.mxu0 %vm262_vm1, %v380_v18  ;;  %v579_v19 = vld [vmem:[#allocation2 + $0x2] sm:$0xff]  ;;  %v351_v21 = vld [vmem:[#allocation2 + $0xf] sm:$0x1]  ;;  %347 = vst.msk [vmem:[#allocation2 + $0x60] sm:$0x1] %vm342_vm2, %v338_v42  ;;  %v2946_v53 = vld [vmem:[#allocation2 + $0x51] sm:$0xff] }
  0x27   : > { %v368_v20 = vld [vmem:[#allocation2 + $0x8] sm:$0xff]  ;;  %2449 = vmatmul.msk.f32.vlgmr.msra.gmra.mxu2 %vm262_vm1, %v579_v19  ;;  %359 = vst.msk [vmem:[#allocation2 + $0x11] sm:$0x1] %vm342_vm2, %v351_v21  ;;  %v2910_v43 = vld [vmem:[#allocation2 + $0x30] sm:$0xff]  ;;  %v334_v55 = vld [vmem:[#allocation2 + $0x2] sm:$0x1]  ;;  %2476 = vmatpush.msk.msra.mxu0 %vm430_vm0, %v2475_v59 }
  0x28   : > { %2436 = vmatmul.msk.f32.vlgmr.msra.gmra.mxu1 %vm262_vm1, %v368_v20  ;;  %v381_v25 = vld [vmem:[#allocation2 + $0x9] sm:$0xff]  ;;  %v335_v27 = vld [vmem:[#allocation2 + $0x1a] sm:$0x1]  ;;  %s3525_s11 = smov (!%p307_p3, %s3523_s11), 0  ;;  %343 = vst.msk [vmem:[#allocation2] sm:$0x1] %vm342_vm2, %v334_v55 }
  0x29   : > { %344 = vst.msk [vmem:[#allocation2 + $0x18] sm:$0x1] %vm342_vm2, %v335_v27  ;;  %v352_v28 = vld [vmem:[#allocation2 + $0x27] sm:$0x1]  ;;  %v2881_v32 = vld [vmem:[#allocation2 + $0x19] sm:$0xff]  ;;  %s3527_s11 = smov (!%p2408_p4, %s3525_s11), 15 }
  0x2a   : > { %360 = vst.msk [vmem:[#allocation2 + $0x29] sm:$0x1] %vm342_vm2, %v352_v28  ;;  %v2886_v35 = vld [vmem:[#allocation2 + $0x1a] sm:$0xff]  ;;  %s2413_s19 = sshll.u32 %s3527_s11, 4  ;;  %v376_v62 = vld [vmem:[#allocation2 + $0x68] sm:$0xff]  ;;  %s3529_s9 = smov (%p319_p5, %s318_s9), 1 }
  0x2b   : > { %2446 = vmatmul.msk.f32.gmra.mxu3 %vm262_vm1, %v2853_v15  ;;  %v370_v38 = vld [vmem:[#allocation2 + $0x20] sm:$0xff]  ;;  %v373_v49 = vld [vmem:[#allocation2 + $0x48] sm:$0xff]  ;;  %s312_s27 = scalar_lea.vmem %s2819_s13, %s2413_s19  ;;  %p321_p6 = scmp.eq.s32.totalorder %s3529_s9, 16 }
  0x2c   : > { %v2897_v39 = vld [vmem:[#allocation2 + $0x21] sm:$0xff]  ;;  %v2949_v54 = vld [vmem:[#allocation2 + $0x52] sm:$0xff] }
  0x2d   : > { %v2928_v48 = vld [vmem:[#allocation2 + $0x3a] sm:$0xff]  ;;  %v314_v5 = vld [vmem:[%s312_s27 + $0x8] sm:$0xff]  ;;  %s3531_s9 = smov (%p321_p6, %s3529_s9), 14 }
  0x2e   : > { %2423 = vmatmul.msk.f32.gmra.mxu0 %vm262_vm1, %v381_v25  ;;  %v580_v29 = vld [vmem:[#allocation2 + $0xa] sm:$0xff]  ;;  %v375_v56 = vld [vmem:[#allocation2 + $0x60] sm:$0xff]  ;;  %317 = vst.msk [vmem:[#allocation2 + $0x99] sm:$0xff] %vm262_vm1, %v314_v5  ;;  %p323_p7 = scmp.gt.s32.totalorder %s3531_s9, 0  ;;  %p2414_p8 = scmp.lt.s32.totalorder %s3531_s9, 15 }
  0x2f   : > { %2450 = vmatmul.msk.f32.gmra.mxu2 %vm262_vm1, %v580_v29  ;;  %v313_v0 = vld [vmem:[%s312_s27] sm:$0xff] }
  0x30   : > { %v369_v33 = vld [vmem:[#allocation2 + $0x18] sm:$0xff]  ;;  %316 = vst.msk [vmem:[#allocation2 + $0x91] sm:$0xff] %vm262_vm1, %v313_v0  ;;  %v3002_v4 = vld [vmem:[#allocation2 + $0x81] sm:$0xff]  ;;  %s324_s7 = scalar_select %p323_p7, %s3531_s9, 0 }
  0x31   : > { %2437 = vmatmul.msk.f32.gmra.mxu1 %vm262_vm1, %v369_v33  ;;  %v2902_v41 = vld [vmem:[#allocation2 + $0x22] sm:$0xff] }
  0x32   : > { %v367_v6 = vld [vmem:[#allocation2] sm:$0xff]  ;;  %s3533_s7 = smov (!%p2414_p8, %s324_s7), 15 }
  0x33   : > { %2458 = vmatmul.msk.f32.vlgmr.msrb.gmra.mxu3 %vm262_vm1, %v2870_v26  ;;  %v2531_v7 = vld [vmem:[%s3487_s1 + $0x20] sm:$0xf]  ;;  %s2419_s10 = sshll.u32 %s3533_s7, 4 }
  0x34   : > { %2518 = vmatpush.msk.msrb.mxu3 %vm430_vm0, %v2517_v60  ;;  %s328_s11 = scalar_lea.vmem %s2819_s13, %s2419_s10 }
  0x35   : > { %v329_v17 = vld [vmem:[%s328_s11] sm:$0xff]  ;;  %v357_v37 = vld [vmem:[#allocation2 + $0x9f] sm:$0x1] }
  0x36   : > { %2424 = vmatmul.msk.f32.gmra.mxu0 %vm262_vm1, %v2881_v32  ;;  %332 = vst.msk [vmem:[#allocation2 + $0xa9] sm:$0xff] %vm262_vm1, %v329_v17 }
  0x37   : > { %2451 = vmatmul.msk.f32.gmra.mxu2 %vm262_vm1, %v2886_v35  ;;  %v340_v3 = vld [vmem:[#allocation2 + $0x92] sm:$0x1]  ;;  %v708_v9 = vld [vmem:[#allocation2 + $0x98] sm:$0xff]  ;;  %365 = vst.msk [vmem:[#allocation2 + $0xa1] sm:$0x1] %vm342_vm2, %v357_v37 }
  0x38   : > { %349 = vst.msk [vmem:[#allocation2 + $0x90] sm:$0x1] %vm342_vm2, %v340_v3  ;;  %v3089_v36 = vld [vmem:[#allocation2 + $0x92] sm:$0xff] }
  0x39   : > { %2438 = vmatmul.msk.f32.gmra.mxu1 %vm262_vm1, %v370_v38 }
  0x3b   : > { %2459 = vmatmul.msk.f32.gmra.mxu3 %vm262_vm1, %v2883_v34 }
  0x3d   : > { %v341_v23 = vld [vmem:[#allocation2 + $0xaa] sm:$0x1] }
  0x3e   : > { %2425 = vmatmul.msk.f32.gmra.mxu0 %vm262_vm1, %v2897_v39  ;;  %350 = vst.msk [vmem:[#allocation2 + $0xa8] sm:$0x1] %vm342_vm2, %v341_v23  ;;  %v1179_v37 = vld [vmem:[#allocation2 + $0xa9] sm:$0xff] }
  0x3f   : > { %2452 = vmatmul.msk.f32.gmra.mxu2 %vm262_vm1, %v2902_v41  ;;  %v707_v8 = vld [vmem:[#allocation2 + $0x90] sm:$0xff] }
  0x41   : > { %2439 = vmatmul.msk.f32.gmra.mxu1 %vm262_vm1, %v2910_v43 }
  0x43   : > { %2460 = vmatmul.msk.f32.gmra.mxu3 %vm262_vm1, %v2899_v40 }
  0x45   : > { %v1061_v31 = vld [vmem:[#allocation2 + $0xa8] sm:$0xff] }
  0x46   : > { %2426 = vmatmul.msk.f32.gmra.mxu0 %vm262_vm1, %v2913_v44 }
  0x47   : > { %2453 = vmatmul.msk.f32.gmra.mxu2 %vm262_vm1, %v2917_v45 }
  0x49   : > { %2440 = vmatmul.msk.f32.gmra.mxu1 %vm262_vm1, %v372_v46 }
  0x4b   : > { %2463 = vmatmul.msk.f32.vlgmr.msra.gmra.mxu3 %vm262_vm1, %v369_v33 }
  0x4e   : > { %2427 = vmatmul.msk.f32.gmra.mxu0 %vm262_vm1, %v2925_v47 }
  0x4f   : > { %2454 = vmatmul.msk.f32.gmra.mxu2 %vm262_vm1, %v2928_v48 }
  0x51   : > { %2441 = vmatmul.msk.f32.gmra.mxu1 %vm262_vm1, %v373_v49 }
  0x53   : > { %2464 = vmatmul.msk.f32.gmra.mxu3 %vm262_vm1, %v370_v38 }
  0x56   : > { %2428 = vmatmul.msk.f32.gmra.mxu0 %vm262_vm1, %v2935_v50 }
  0x57   : > { %2455 = vmatmul.msk.f32.gmra.mxu2 %vm262_vm1, %v2938_v51 }
  0x59   : > { %2442 = vmatmul.msk.f32.gmra.mxu1 %vm262_vm1, %v374_v52 }
  0x5b   : > { %2465 = vmatmul.msk.f32.gmra.mxu3 %vm262_vm1, %v2910_v43 }
  0x5e   : > { %2429 = vmatmul.msk.f32.gmra.mxu0 %vm262_vm1, %v2946_v53 }
  0x5f   : > { %2456 = vmatmul.msk.f32.gmra.mxu2 %vm262_vm1, %v2949_v54 }
  0x61   : > { %2443 = vmatmul.msk.f32.gmra.mxu1 %vm262_vm1, %v375_v56 }
  0x63   : > { %2466 = vmatmul.msk.f32.gmra.mxu3 %vm262_vm1, %v372_v46 }
  0x66   : > { %2430 = vmatmul.msk.f32.gmra.mxu0 %vm262_vm1, %v2957_v57 }
  0x67   : > { %2457 = vmatmul.msk.f32.gmra.mxu2 %vm262_vm1, %v2960_v58 }
  0x69   : > { %2444 = vmatmul.msk.f32.gmra.mxu1 %vm262_vm1, %v376_v62 }
  0x6b   : > { %2467 = vmatmul.msk.f32.gmra.mxu3 %vm262_vm1, %v373_v49 }
  0x6e   : > { %2431 = vmatmul.msk.f32.gmra.mxu0 %vm262_vm1, %v2980_v63 }
  0x6f   : > { %2505 = vmatmul.msk.f32.vlgmr.msrb.gmra.mxu2 %vm262_vm1, %v2910_v43 }
  0x71   : > { %2491 = vmatmul.msk.f32.vlgmr.msrb.gmra.mxu1 %vm262_vm1, %v2886_v35 }
  0x73   : > { %2468 = vmatmul.msk.f32.gmra.mxu3 %vm262_vm1, %v374_v52 }
  0x76   : > { %2432 = vmatmul.msk.f32.gmra.mxu0 %vm262_vm1, %v2993_v2 }
  0x77   : > { %2506 = vmatmul.msk.f32.gmra.mxu2 %vm262_vm1, %v372_v46 }
  0x79   : > { %2492 = vmatmul.msk.f32.gmra.mxu1 %vm262_vm1, %v2902_v41 }
  0x7b   : > { %2469 = vmatmul.msk.f32.gmra.mxu3 %vm262_vm1, %v375_v56 }
  0x7e   : > { %2433 = vmatmul.msk.f32.gmra.mxu0 %vm262_vm1, %v3002_v4 }
  0x7f   : > { %2507 = vmatmul.msk.f32.gmra.mxu2 %vm262_vm1, %v373_v49 }
  0x81   : > { %2493 = vmatmul.msk.f32.gmra.mxu1 %vm262_vm1, %v2917_v45 }
  0x83   : > { %2470 = vmatmul.msk.f32.gmra.mxu3 %vm262_vm1, %v376_v62 }
  0x86   : > { %2435 = vmatmul.msk.f32.vlgmr.msrb.gmra.mxu0 %vm262_vm1, %v367_v6 }
  0x87   : > { %2532 = vmatpush.msk.msrb.mxu0 %vm430_vm0, %v2531_v7  ;;  %2508 = vmatmul.msk.f32.gmra.mxu2 %vm262_vm1, %v374_v52  ;;  %v825_v7 = vld [vmem:[#allocation2 + $0x91] sm:$0xff] }
  0x89   : > { %2494 = vmatmul.msk.f32.gmra.mxu1 %vm262_vm1, %v2928_v48 }
  0x8b   : > { %2471 = vmatmul.msk.f32.gmra.mxu3 %vm262_vm1, %v2842_v10 }
  0x8e   : > { %2477 = vmatmul.msk.f32.vlgmr.msra.gmra.mxu0 %vm262_vm1, %v2881_v32  ;;  %v330_v32 = vld [vmem:[%s328_s11 + $0x8] sm:$0xff] }
  0x8f   : > { %2509 = vmatmul.msk.f32.gmra.mxu2 %vm262_vm1, %v375_v56  ;;  %333 = vst.msk [vmem:[#allocation2 + $0xb1] sm:$0xff] %vm262_vm1, %v330_v32 }
  0x91   : > { %2495 = vmatmul.msk.f32.gmra.mxu1 %vm262_vm1, %v2938_v51 }
  0x93   : > { %2472 = vmatmul.msk.f32.gmra.mxu3 %vm262_vm1, %v2853_v15 }
  0x96   : > { %2478 = vmatmul.msk.f32.gmra.mxu0 %vm262_vm1, %v2897_v39  ;;  %v1062_v43 = vld [vmem:[#allocation2 + $0xb0] sm:$0xff] }
  0x97   : > { %2510 = vmatmul.msk.f32.gmra.mxu2 %vm262_vm1, %v376_v62 }
  0x99   : > { %2496 = vmatmul.msk.f32.gmra.mxu1 %vm262_vm1, %v2949_v54 }
  0x9b   : > { %2473 = vmatmul.msk.f32.gmra.mxu3 %vm262_vm1, %v707_v8 }
  0x9e   : > { %2479 = vmatmul.msk.f32.gmra.mxu0 %vm262_vm1, %v2913_v44 }
  0x9f   : > { %2511 = vmatmul.msk.f32.gmra.mxu2 %vm262_vm1, %v2842_v10 }
  0xa1   : > { %2497 = vmatmul.msk.f32.gmra.mxu1 %vm262_vm1, %v2960_v58 }
  0xa3   : > { %2474 = vmatmul.msk.f32.gmra.mxu3 %vm262_vm1, %v708_v9  ;;  %v3044_v12 = vpop.f32.mrf.mxu0 }
  0xa5   : > { %v546_v13 = vpop.f32.mrf.mxu1 }
  0xa6   : > { %v3042_v11 = vpop.f32.mrf.mxu3  ;;  %2480 = vmatmul.msk.f32.gmra.mxu0 %vm262_vm1, %v2925_v47 }
  0xa7   : > { %2512 = vmatmul.msk.f32.gmra.mxu2 %vm262_vm1, %v2853_v15 }
  0xa9   : > { %2498 = vmatmul.msk.f32.gmra.mxu1 %vm262_vm1, %v2870_v26 }
  0xaa   : > { %v3056_v14 = vpop.f32.mrf.mxu2 }
  0xab   : > { %2519 = vmatmul.msk.f32.vlgmr.msrb.gmra.mxu3 %vm262_vm1, %v2913_v44  ;;  %v454_v16 = vpop.f32.mrf.mxu0 }
  0xac   : > { %v547_v19 = vadd.f32 %v546_v13, %v454_v16 }
  0xae   : > { %v3054_v10 = vpop.f32.mrf.mxu3  ;;  %2481 = vmatmul.msk.f32.gmra.mxu0 %vm262_vm1, %v2935_v50  ;;  %v549_v15 = vpop.f32.mrf.mxu1 }
  0xaf   : > { %2513 = vmatmul.msk.f32.gmra.mxu2 %vm262_vm1, %v707_v8 }
  0xb1   : > { %2499 = vmatmul.msk.f32.gmra.mxu1 %vm262_vm1, %v2883_v34 }
  0xb2   : > { %v652_v20 = vpop.f32.mrf.mxu2 }
  0xb3   : > { %2520 = vmatmul.msk.f32.gmra.mxu3 %vm262_vm1, %v2925_v47  ;;  %v457_v21 = vpop.f32.mrf.mxu0  ;;  %v686_v22 = vadd.f32 %v652_v20, %v547_v19  ;;  %v3101_v47 = vld [vmem:[#allocation2 + $0x9a] sm:$0xff] }
  0xb4   : > { %v550_v27 = vadd.f32 %v549_v15, %v457_v21  ;;  %v826_v19 = vld [vmem:[#allocation2 + $0x99] sm:$0xff] }
  0xb6   : > { %v3067_v18 = vpop.f32.mrf.mxu3  ;;  %2482 = vmatmul.msk.f32.gmra.mxu0 %vm262_vm1, %v2946_v53  ;;  %v552_v24 = vpop.f32.mrf.mxu1 }
  0xb7   : > { %2514 = vmatmul.msk.f32.gmra.mxu2 %vm262_vm1, %v708_v9 }
  0xb9   : > { %2500 = vmatmul.msk.f32.gmra.mxu1 %vm262_vm1, %v2899_v40 }
  0xba   : > { %v655_v28 = vpop.f32.mrf.mxu2 }
  0xbb   : > { %2521 = vmatmul.msk.f32.gmra.mxu3 %vm262_vm1, %v2935_v50  ;;  %v460_v29 = vpop.f32.mrf.mxu0  ;;  %v687_v30 = vadd.f32 %v655_v28, %v550_v27 }
  0xbc   : > { %v553_v38 = vadd.f32 %v552_v24, %v460_v29 }
  0xbe   : > { %v3077_v25 = vpop.f32.mrf.mxu3  ;;  %2483 = vmatmul.msk.f32.gmra.mxu0 %vm262_vm1, %v2957_v57  ;;  %v555_v33 = vpop.f32.mrf.mxu1 }
  0xbf   : > { %2515 = vmatmul.msk.f32.gmra.mxu2 %vm262_vm1, %v1061_v31 }
  0xc1   : > { %2501 = vmatmul.msk.f32.gmra.mxu1 %vm262_vm1, %v3089_v36 }
  0xc2   : > { %v658_v39 = vpop.f32.mrf.mxu2 }
  0xc3   : > { %2522 = vmatmul.msk.f32.gmra.mxu3 %vm262_vm1, %v2946_v53  ;;  %v463_v41 = vpop.f32.mrf.mxu0  ;;  %v688_v42 = vadd.f32 %v658_v39, %v553_v38 }
  0xc4   : > { %v556_v49 = vadd.f32 %v555_v33, %v463_v41 }
  0xc6   : > { %v3087_v35 = vpop.f32.mrf.mxu3  ;;  %2484 = vmatmul.msk.f32.gmra.mxu0 %vm262_vm1, %v2980_v63  ;;  %v558_v44 = vpop.f32.mrf.mxu1 }
  0xc7   : > { %2516 = vmatmul.msk.f32.gmra.mxu2 %vm262_vm1, %v1062_v43 }
  0xc9   : > { %2502 = vmatmul.msk.f32.gmra.mxu1 %vm262_vm1, %v3101_v47 }
  0xca   : > { %v661_v50 = vpop.f32.mrf.mxu2 }
  0xcb   : > { %2523 = vmatmul.msk.f32.gmra.mxu3 %vm262_vm1, %v2957_v57  ;;  %v466_v52 = vpop.f32.mrf.mxu0  ;;  %v689_v53 = vadd.f32 %v661_v50, %v556_v49 }
  0xcc   : > { %v559_v57 = vadd.f32 %v558_v44, %v466_v52 }
  0xce   : > { %v3099_v46 = vpop.f32.mrf.mxu3  ;;  %2485 = vmatmul.msk.f32.gmra.mxu0 %vm262_vm1, %v2993_v2  ;;  %v561_v55 = vpop.f32.mrf.mxu1 }
  0xd2   : > { %v664_v60 = vpop.f32.mrf.mxu2 }
  0xd3   : > { %2524 = vmatmul.msk.f32.gmra.mxu3 %vm262_vm1, %v2980_v63  ;;  %v469_v61 = vpop.f32.mrf.mxu0  ;;  %v690_v62 = vadd.f32 %v664_v60, %v559_v57 }
  0xd4   : > { %v562_v3 = vadd.f32 %v561_v55, %v469_v61 }
  0xd6   : > { %v770_v56 = vpop.f32.mrf.mxu3  ;;  %2486 = vmatmul.msk.f32.gmra.mxu0 %vm262_vm1, %v3002_v4  ;;  %v564_v0 = vpop.f32.mrf.mxu1 }
  0xd7   : > { %v3109_v59 = vadd.f32 %v770_v56, %v686_v22 }
  0xda   : > { %v667_v63 = vpop.f32.mrf.mxu2 }
  0xdb   : > { %2525 = vmatmul.msk.f32.gmra.mxu3 %vm262_vm1, %v2993_v2  ;;  %v472_v6 = vpop.f32.mrf.mxu0  ;;  %v691_v8 = vadd.f32 %v667_v63, %v562_v3 }
  0xdc   : > { %v565_v16 = vadd.f32 %v564_v0, %v472_v6 }
  0xde   : > { %v773_v1 = vpop.f32.mrf.mxu3  ;;  %2487 = vmatmul.msk.f32.gmra.mxu0 %vm262_vm1, %v825_v7  ;;  %v567_v9 = vpop.f32.mrf.mxu1 }
  0xdf   : > { %v3115_v5 = vadd.f32 %v773_v1, %v687_v30 }
  0xe2   : > { %v670_v15 = vpop.f32.mrf.mxu2 }
  0xe3   : > { %2526 = vmatmul.msk.f32.gmra.mxu3 %vm262_vm1, %v3002_v4  ;;  %v475_v2 = vpop.f32.mrf.mxu0  ;;  %v692_v20 = vadd.f32 %v670_v15, %v565_v16 }
  0xe4   : > { %v568_v23 = vadd.f32 %v567_v9, %v475_v2 }
  0xe6   : > { %v776_v13 = vpop.f32.mrf.mxu3  ;;  %2488 = vmatmul.msk.f32.gmra.mxu0 %vm262_vm1, %v826_v19  ;;  %v570_v21 = vpop.f32.mrf.mxu1 }
  0xe7   : > { %v806_v17 = vadd.f32 %v776_v13, %v688_v42  ;;  %v1180_v42 = vld [vmem:[#allocation2 + $0xb1] sm:$0xff] }
  0xea   : > { %v673_v27 = vpop.f32.mrf.mxu2 }
  0xeb   : > { %2527 = vmatmul.msk.f32.gmra.mxu3 %vm262_vm1, %v825_v7  ;;  %v478_v28 = vpop.f32.mrf.mxu0  ;;  %v693_v29 = vadd.f32 %v673_v27, %v568_v23 }
  0xec   : > { %v571_v4 = vadd.f32 %v570_v21, %v478_v28 }
  0xee   : > { %v779_v22 = vpop.f32.mrf.mxu3  ;;  %2533 = vmatmul.msk.f32.vlgmr.msrb.gmra.mxu0 %vm262_vm1, %v2917_v45  ;;  %v694_v30 = vadd.f32 %v3067_v18, %v571_v4  ;;  %v1003_v9 = vpop.f32.mrf.mxu1 }
  0xef   : > { %v807_v24 = vadd.f32 %v779_v22, %v689_v53 }
  0xf2   : > { %v1121_v16 = vpop.f32.mrf.mxu2 }
  0xf3   : > { %2528 = vmatmul.msk.f32.gmra.mxu3 %vm262_vm1, %v826_v19  ;;  %v481_v33 = vpop.f32.mrf.mxu0 }
  0xf4   : > { %v574_v60 = vadd.f32 %v3042_v11, %v481_v33  ;;  %v3177_v33 = vld [vmem:[%s3488_s2] ss:$0 sm:$0xff] }
  0xf6   : > { %v782_v31 = vpop.f32.mrf.mxu3  ;;  %2534 = vmatmul.msk.f32.gmra.mxu0 %vm262_vm1, %v2928_v48  ;;  %v1006_v2 = vpop.f32.mrf.mxu1 }
  0xf7   : > { %v808_v32 = vadd.f32 %v782_v31, %v690_v62 }
  0xfa   : > { %v1124_v19 = vpop.f32.mrf.mxu2 }
  0xfb   : > { %2529 = vmatmul.msk.f32.gmra.mxu3 %vm262_vm1, %v1179_v37  ;;  %v484_v41 = vpop.f32.mrf.mxu0 }
  0xfc   : > { %v577_v62 = vadd.f32 %v3054_v10, %v484_v41 }
  0xfe   : > { %v785_v38 = vpop.f32.mrf.mxu3  ;;  %2535 = vmatmul.msk.f32.gmra.mxu0 %vm262_vm1, %v2938_v51  ;;  %v696_v11 = vadd.f32 %v3087_v35, %v577_v62  ;;  %v1009_v23 = vpop.f32.mrf.mxu1 }
  0xff   : > { %v809_v39 = vadd.f32 %v785_v38, %v691_v8 }
 0x103   : > { %2530 = vmatmul.msk.f32.gmra.mxu3 %vm262_vm1, %v1180_v42  ;;  %v543_v43 = vpop.f32.mrf.mxu0 }
 0x104   : > { %v544_v44 = vadd.f32 %v543_v43, %v3044_v12 }
 0x106   : > { %v788_v45 = vpop.f32.mrf.mxu3  ;;  %v685_v49 = vadd.f32 %v3056_v14, %v544_v44  ;;  %2536 = vmatmul.msk.f32.gmra.mxu0 %vm262_vm1, %v2949_v54  ;;  %v695_v54 = vadd.f32 %v3077_v25, %v574_v60  ;;  %v1012_v31 = vpop.f32.mrf.mxu1 }
 0x107   : > { %v810_v18 = vadd.f32 %v788_v45, %v692_v20 }
 0x108   : > { %v803_v48 = vadd.f32 %v3099_v46, %v685_v49 }
 0x10b   : > { %v885_v53 = vpop.f32.mrf.mxu0 }
 0x10c   : > { %v921_v55 = vadd.f32 %v885_v53, %v803_v48 }
 0x10e   : > { %v791_v50 = vpop.f32.mrf.mxu3  ;;  %2537 = vmatmul.msk.f32.gmra.mxu0 %vm262_vm1, %v2960_v58  ;;  %v358_v58 = vld [vmem:[#allocation2 + $0xb7] sm:$0x1]  ;;  %v1039_v28 = vadd.f32 %v1003_v9, %v921_v55  ;;  %v1015_v49 = vpop.f32.mrf.mxu1 }
 0x10f   : > { %v811_v52 = vadd.f32 %v791_v50, %v693_v29  ;;  %366 = vst.msk [vmem:[#allocation2 + $0xb9] sm:$0x1] %vm342_vm2, %v358_v58 }
 0x113   : > { %v888_v57 = vpop.f32.mrf.mxu0 }
 0x114   : > { %v922_v12 = vadd.f32 %v888_v57, %v3109_v59 }
 0x116   : > { %v794_v51 = vpop.f32.mrf.mxu3  ;;  %2538 = vmatmul.msk.f32.gmra.mxu0 %vm262_vm1, %v2870_v26  ;;  %v1040_v38 = vadd.f32 %v1006_v2, %v922_v12 }
 0x117   : > { %v812_v56 = vadd.f32 %v794_v51, %v694_v30  ;;  %v1157_v30 = vadd.f32 %v1121_v16, %v1039_v28 }
 0x11b   : > { %v891_v61 = vpop.f32.mrf.mxu0 }
 0x11c   : > { %v923_v0 = vadd.f32 %v891_v61, %v3115_v5  ;;  %v1297_v5 = vld [vmem:[#allocation2 + $0xaa] sm:$0xff] }
 0x11e   : > { %v797_v14 = vpop.f32.mrf.mxu3  ;;  %2539 = vmatmul.msk.f32.gmra.mxu0 %vm262_vm1, %v2883_v34  ;;  %v1041_v50 = vadd.f32 %v1009_v23, %v923_v0 }
 0x11f   : > { %v813_v46 = vadd.f32 %v797_v14, %v695_v54 }
 0x123   : > { %v894_v26 = vpop.f32.mrf.mxu0 }
 0x124   : > { %v924_v3 = vadd.f32 %v894_v26, %v806_v17 }
 0x126   : > { %v800_v59 = vpop.f32.mrf.mxu3  ;;  %2540 = vmatmul.msk.f32.gmra.mxu0 %vm262_vm1, %v2899_v40  ;;  %v1298_v40 = vld [vmem:[#allocation2 + $0xb2] sm:$0xff]  ;;  %v1042_v54 = vadd.f32 %v1012_v31, %v924_v3 }
 0x127   : > { %v814_v1 = vadd.f32 %v800_v59, %v696_v11 }
 0x12b   : > { %v897_v25 = vpop.f32.mrf.mxu0 }
 0x12c   : > { %v3152_v63 = vadd.f32 %v897_v25, %v807_v24  ;;  %v1127_v24 = vpop.f32.mrf.mxu2 }
 0x12d   : > { %v1159_v51 = vadd.f32 %v1127_v24, %v1041_v50 }
 0x12e   : > { %2541 = vmatmul.msk.f32.gmra.mxu0 %vm262_vm1, %v3089_v36  ;;  %v1239_v17 = vpop.f32.mrf.mxu3  ;;  %v1043_v26 = vadd.f32 %v1015_v49, %v3152_v63 }
 0x133   : > { %v900_v10 = vpop.f32.mrf.mxu0 }
 0x134   : > { %v3156_v34 = vadd.f32 %v900_v10, %v808_v32  ;;  %v1275_v32 = vadd.f32 %v1239_v17, %v1157_v30  ;;  %v1130_v41 = vpop.f32.mrf.mxu2 }
 0x135   : > { %v1160_v62 = vadd.f32 %v1130_v41, %v1042_v54 }
 0x136   : > { %2542 = vmatmul.msk.f32.gmra.mxu0 %vm262_vm1, %v3101_v47  ;;  %v1242_v20 = vpop.f32.mrf.mxu3 }
 0x13b   : > { %v903_v35 = vpop.f32.mrf.mxu0 }
 0x13c   : > { %v3160_v6 = vadd.f32 %v903_v35, %v809_v39  ;;  %v1133_v55 = vpop.f32.mrf.mxu2 }
 0x13e   : > { %2543 = vmatmul.msk.f32.gmra.mxu0 %vm262_vm1, %v1297_v5  ;;  %v1245_v4 = vpop.f32.mrf.mxu3  ;;  %v1161_v5 = vadd.f32 %v1133_v55, %v1043_v26 }
 0x13f   : > { %v1277_v60 = vadd.f32 %v1245_v4, %v1159_v51 }
 0x143   : > { %v906_v7 = vpop.f32.mrf.mxu0 }
 0x144   : > { %v3163_v8 = vadd.f32 %v906_v7, %v810_v18  ;;  %v1158_v18 = vadd.f32 %v1124_v19, %v1040_v38  ;;  %v1136_v11 = vpop.f32.mrf.mxu2 }
 0x146   : > { %2544 = vmatmul.msk.f32.gmra.mxu0 %vm262_vm1, %v1298_v40  ;;  %v1248_v45 = vpop.f32.mrf.mxu3  ;;  %v1276_v44 = vadd.f32 %v1242_v20, %v1158_v18 }
 0x147   : > { %v1278_v0 = vadd.f32 %v1248_v45, %v1160_v62 }
 0x14b   : > { %v909_v36 = vpop.f32.mrf.mxu0 }
 0x14c   : > { %v3166_v13 = vadd.f32 %v909_v36, %v811_v52  ;;  %v1139_v40 = vpop.f32.mrf.mxu2 }
 0x14e   : > { %v1251_v57 = vpop.f32.mrf.mxu3 }
 0x14f   : > { %v1279_v7 = vadd.f32 %v1251_v57, %v1161_v5 }
 0x153   : > { %v912_v15 = vpop.f32.mrf.mxu0 }
 0x154   : > { %v3168_v47 = vadd.f32 %v912_v15, %v812_v56 }
 0x156   : > { %v1254_v59 = vpop.f32.mrf.mxu3 }
 0x15b   : > { %v915_v21 = vpop.f32.mrf.mxu0 }
 0x15c   : > { %v3170_v22 = vadd.f32 %v915_v21, %v813_v46  ;;  %v1018_v46 = vpop.f32.mrf.mxu1 }
 0x15d   : > { %v1044_v36 = vadd.f32 %v1018_v46, %v3156_v34 }
 0x15e   : > { %v1257_v17 = vpop.f32.mrf.mxu3 }
 0x15f   : > { %v1162_v2 = vadd.f32 %v1136_v11, %v1044_v36 }
 0x161   : > { %v1280_v20 = vadd.f32 %v1254_v59, %v1162_v2 }
 0x163   : > { %v918_v27 = vpop.f32.mrf.mxu0 }
 0x164   : > { %v3172_v29 = vadd.f32 %v918_v27, %v814_v1  ;;  %v1021_v35 = vpop.f32.mrf.mxu1  ;;  %v1142_v27 = vpop.f32.mrf.mxu2 }
 0x165   : > { %v1045_v23 = vadd.f32 %v1021_v35, %v3160_v6 }
 0x166   : > { %v1260_v4 = vpop.f32.mrf.mxu3 }
 0x167   : > { %v1163_v30 = vadd.f32 %v1139_v40, %v1045_v23 }
 0x169   : > { %v1281_v31 = vadd.f32 %v1257_v17, %v1163_v30 }
 0x16b   : > { %v1357_v37 = vpop.f32.mrf.mxu0 }
 0x16c   : > { %v1393_v39 = vadd.f32 %v1357_v37, %v1275_v32  ;;  %v1024_v63 = vpop.f32.mrf.mxu1 }
 0x16d   : > { %v1046_v38 = vadd.f32 %v1024_v63, %v3163_v8 }
 0x16e   : > { %v1409_v42 = vadd.f32 %v3177_v33, %v1393_v39  ;;  %v1263_v18 = vpop.f32.mrf.mxu3 }
 0x16f   : > { %v1164_v45 = vadd.f32 %v1142_v27, %v1046_v38 }
 0x170   : > { %v1421_v43 = vmax.f32 %v1409_v42, 0.0  ;;  %v1145_v42 = vpop.f32.mrf.mxu2 }
 0x172   : > { %1433 = vst.msk [vmem:[#allocation3 + $0x1] sm:$0xff] %vm262_vm1, %v1421_v43  ;;  %v1282_v43 = vadd.f32 %v1260_v4, %v1164_v45 }
 0x173   : > { %v1360_v48 = vpop.f32.mrf.mxu0 }
 0x174   : > { %v1394_v52 = vadd.f32 %v1360_v48, %v1276_v44  ;;  %v1027_v32 = vpop.f32.mrf.mxu1 }
 0x175   : > { %v1047_v49 = vadd.f32 %v1027_v32, %v3166_v13 }
 0x176   : > { %v1410_v53 = vadd.f32 %v3177_v33, %v1394_v52 }
 0x178   : > { %v1422_v56 = vmax.f32 %v1410_v53, 0.0  ;;  %v1165_v53 = vadd.f32 %v1145_v42, %v1047_v49  ;;  %v1148_v8 = vpop.f32.mrf.mxu2 }
 0x17a   : > { %1434 = vst.msk [vmem:[#allocation3 + $0x9] sm:$0xff] %vm262_vm1, %v1422_v56  ;;  %v1283_v51 = vadd.f32 %v1263_v18, %v1165_v53  ;;  %v1266_v56 = vpop.f32.mrf.mxu3 }
 0x17b   : > { %v1363_v12 = vpop.f32.mrf.mxu0 }
 0x17c   : > { %v1395_v14 = vadd.f32 %v1363_v12, %v1277_v60  ;;  %v1030_v50 = vpop.f32.mrf.mxu1 }
 0x17d   : > { %v1048_v60 = vadd.f32 %v1030_v50, %v3168_v47 }
 0x17e   : > { %v1411_v61 = vadd.f32 %v3177_v33, %v1395_v14 }
 0x17f   : > { %v1166_v46 = vadd.f32 %v1148_v8, %v1048_v60 }
 0x180   : > { %v1423_v58 = vmax.f32 %v1411_v61, 0.0  ;;  %v1151_v62 = vpop.f32.mrf.mxu2 }
 0x181   : > { %v1284_v61 = vadd.f32 %v1266_v56, %v1166_v46 }
 0x182   : > { %1435 = vst.msk [vmem:[#allocation3 + $0x19] sm:$0xff] %vm262_vm1, %v1423_v58  ;;  %v1269_v59 = vpop.f32.mrf.mxu3 }
 0x183   : > { %v1366_v1 = vpop.f32.mrf.mxu0 }
 0x184   : > { %v1396_v25 = vadd.f32 %v1366_v1, %v1278_v0  ;;  %v1033_v14 = vpop.f32.mrf.mxu1 }
 0x185   : > { %v1049_v11 = vadd.f32 %v1033_v14, %v3170_v22 }
 0x186   : > { %v1412_v10 = vadd.f32 %v3177_v33, %v1396_v25 }
 0x187   : > { %v1167_v26 = vadd.f32 %v1151_v62, %v1049_v11 }
 0x188   : > { %v1424_v3 = vmax.f32 %v1412_v10, 0.0 }
 0x189   : > { %v1285_v10 = vadd.f32 %v1269_v59, %v1167_v26 }
 0x18a   : > { %1436 = vst.msk [vmem:[#allocation3 + $0x21] sm:$0xff] %vm262_vm1, %v1424_v3 }
 0x18b   : > { %v1369_v9 = vpop.f32.mrf.mxu0 }
 0x18c   : > { %v1397_v16 = vadd.f32 %v1369_v9, %v1279_v7  ;;  %v1036_v47 = vpop.f32.mrf.mxu1  ;;  %v1154_v7 = vpop.f32.mrf.mxu2 }
 0x18d   : > { %v1050_v5 = vadd.f32 %v1036_v47, %v3172_v29  ;;  %v1272_v9 = vpop.f32.mrf.mxu3 }
 0x18e   : > { %v1413_v15 = vadd.f32 %v3177_v33, %v1397_v16 }
 0x18f   : > { %v1168_v36 = vadd.f32 %v1154_v7, %v1050_v5 }
 0x190   : > { %v1425_v19 = vmax.f32 %v1413_v15, 0.0 }
 0x191   : > { %v1286_v16 = vadd.f32 %v1272_v9, %v1168_v36 }
 0x192   : > { %1437 = vst.msk [vmem:[#allocation3 + $0x31] sm:$0xff] %vm262_vm1, %v1425_v19 }
 0x193   : > { %v1372_v21 = vpop.f32.mrf.mxu0 }
 0x194   : > { %v1398_v24 = vadd.f32 %v1372_v21, %v1280_v20 }
 0x196   : > { %v1414_v28 = vadd.f32 %v3177_v33, %v1398_v24 }
 0x198   : > { %v1426_v34 = vmax.f32 %v1414_v28, 0.0 }
 0x19a   : > { %1438 = vst.msk [vmem:[#allocation3 + $0x39] sm:$0xff] %vm262_vm1, %v1426_v34 }
 0x19b   : > { %v1375_v37 = vpop.f32.mrf.mxu0 }
 0x19c   : > { %v1399_v39 = vadd.f32 %v1375_v37, %v1281_v31 }
 0x19e   : > { %v1415_v41 = vadd.f32 %v3177_v33, %v1399_v39 }
 0x1a0   : > { %v1427_v6 = vmax.f32 %v1415_v41, 0.0 }
 0x1a2   : > { %1439 = vst.msk [vmem:[#allocation3 + $0x49] sm:$0xff] %vm262_vm1, %v1427_v6 }
 0x1a3   : > { %v1378_v44 = vpop.f32.mrf.mxu0 }
 0x1a4   : > { %v1400_v48 = vadd.f32 %v1378_v44, %v1282_v43 }
 0x1a6   : > { %v1416_v52 = vadd.f32 %v3177_v33, %v1400_v48 }
 0x1a8   : > { %v1428_v55 = vmax.f32 %v1416_v52, 0.0 }
 0x1aa   : > { %1440 = vst.msk [vmem:[#allocation3 + $0x51] sm:$0xff] %vm262_vm1, %v1428_v55 }
 0x1ab   : > { %v1381_v57 = vpop.f32.mrf.mxu0 }
 0x1ac   : > { %v1401_v12 = vadd.f32 %v1381_v57, %v1283_v51 }
 0x1ae   : > { %v1417_v54 = vadd.f32 %v3177_v33, %v1401_v12 }
 0x1b0   : > { %v1429_v13 = vmax.f32 %v1417_v54, 0.0 }
 0x1b2   : > { %1441 = vst.msk [vmem:[#allocation3 + $0x61] sm:$0xff] %vm262_vm1, %v1429_v13 }
 0x1b3   : > { %v1384_v58 = vpop.f32.mrf.mxu0 }
 0x1b4   : > { %v1402_v0 = vadd.f32 %v1384_v58, %v1284_v61 }
 0x1b6   : > { %v1418_v1 = vadd.f32 %v3177_v33, %v1402_v0 }
 0x1b8   : > { %v1430_v25 = vmax.f32 %v1418_v1, 0.0 }
 0x1ba   : > { %1442 = vst.msk [vmem:[#allocation3 + $0x69] sm:$0xff] %vm262_vm1, %v1430_v25 }
 0x1bb   : > { %v1387_v35 = vpop.f32.mrf.mxu0 }
 0x1bc   : > { %v1403_v3 = vadd.f32 %v1387_v35, %v1285_v10 }
 0x1be   : > { %v1419_v40 = vadd.f32 %v3177_v33, %v1403_v3 }
 0x1c0   : > { %v1431_v22 = vmax.f32 %v1419_v40, 0.0 }
 0x1c2   : > { %1443 = vst.msk [vmem:[#allocation3 + $0x79] sm:$0xff] %vm262_vm1, %v1431_v22 }
 0x1c3   : > { %v1390_v17 = vpop.f32.mrf.mxu0 }
 0x1c4   : > { %v1404_v15 = vadd.f32 %v1390_v17, %v1286_v16 }
 0x1c6   : > { %v1420_v2 = vadd.f32 %v3177_v33, %v1404_v15  ;;  %1448 = sbr.rel (%p2545_p9) target bundleno = 462 (0x1ce), region = 44 }
 0x1c8   : > { %v1432_v19 = vmax.f32 %v1420_v2, 0.0 }
 0x1ca   : > { %1444 = vst.msk [vmem:[#allocation3 + $0x81] sm:$0xff] %vm262_vm1, %v1432_v19 }
 0x1cb   : > { %v1450_v29 = vld [vmem:[#allocation3 + $0x31] sm:$0xff]  ;;  %v1451_v63 = vld [vmem:[#allocation3 + $0x39] sm:$0xff] }
 0x1cc   : > { %1452 = vst.msk [vmem:[#allocation3 + $0x1] sm:$0xff] %vm262_vm1, %v1450_v29 }
 0x1cd   : > { %1453 = vst.msk [vmem:[#allocation3 + $0x9] sm:$0xff] %vm262_vm1, %v1451_v63 }
 0x1ce PF: > { %p2546_p10 = scmp.ne.s32.totalorder %s2715_s18, 3 }
 0x1d0   : > { %1457 = sbr.rel (%p2546_p10) target bundleno = 472 (0x1d8), region = 48 }
 0x1d5   : > { %v1459_v20 = vld [vmem:[#allocation3 + $0x49] sm:$0xff]  ;;  %v1460_v21 = vld [vmem:[#allocation3 + $0x51] sm:$0xff] }
 0x1d6   : > { %1462 = vst.msk [vmem:[#allocation3 + $0x79] sm:$0xff] %vm262_vm1, %v1459_v20 }
 0x1d7   : > { %1463 = vst.msk [vmem:[#allocation3 + $0x81] sm:$0xff] %vm262_vm1, %v1460_v21 }
 0x1d8 PF: > { %v2547_v33 = vld [vmem:[%s3489_s3 + $0x4] sm:$0xf]  ;;  %v1496_v24 = vld [vmem:[%s3489_s3] sm:$0xf]  ;;  %v2586_v28 = vld [vmem:[%s3489_s3 + $0x10] sm:$0xf] }
 0x1d9   : > { %v1497_v23 = vld [vmem:[#allocation3 + $0x1] sm:$0xff]  ;;  %2548 = vmatpush.msk.msra.mxu1 %vm430_vm0, %v2547_v33  ;;  %2557 = vmatpush.msk.msra.mxu2 %vm430_vm0, %v1496_v24  ;;  %v2576_v34 = vld [vmem:[%s3489_s3 + $0xc] sm:$0xf]  ;;  %v1465_v32 = vld [vmem:[#allocation3 + $0x1a] sm:$0x1] }
 0x1da   : > { %v1464_v27 = vld [vmem:[#allocation3 + $0x2] sm:$0x1]  ;;  %2549 = vmatmul.msk.f32.vlgmr.msra.gmra.mxu1 %vm262_vm1, %v1497_v23  ;;  %v2566_v4 = vld [vmem:[%s3489_s3 + $0x8] sm:$0xf]  ;;  %v1476_v31 = vld [vmem:[#allocation3 + $0xf] sm:$0x1] }
 0x1db   : > { %1470 = vst.msk [vmem:[#allocation3] sm:$0x1] %vm342_vm2, %v1464_v27  ;;  %2587 = vmatpush.msk.msrb.mxu2 %vm430_vm0, %v2586_v28  ;;  %v1643_v30 = vld [vmem:[#allocation3 + $0x2] sm:$0xff]  ;;  %2567 = vmatpush.msk.msra.mxu3 %vm430_vm0, %v2566_v4  ;;  %v1466_v38 = vld [vmem:[#allocation3 + $0x32] sm:$0x1]  ;;  %v1499_v18 = vld [vmem:[#allocation3 + $0x19] sm:$0xff] }
 0x1dc   : > { %2568 = vmatmul.msk.f32.vlgmr.msra.gmra.mxu3 %vm262_vm1, %v1643_v30  ;;  %2577 = vmatpush.msk.msrb.mxu1 %vm430_vm0, %v2576_v34  ;;  %1482 = vst.msk [vmem:[#allocation3 + $0x11] sm:$0x1] %vm342_vm2, %v1476_v31  ;;  %v1477_v37 = vld [vmem:[#allocation3 + $0x27] sm:$0x1]  ;;  %v1498_v39 = vld [vmem:[#allocation3 + $0x9] sm:$0xff]  ;;  %v1645_v43 = vld [vmem:[#allocation3 + $0x1a] sm:$0xff] }
 0x1dd   : > { %1471 = vst.msk [vmem:[#allocation3 + $0x18] sm:$0x1] %vm342_vm2, %v1465_v32  ;;  %v1478_v45 = vld [vmem:[#allocation3 + $0x3f] sm:$0x1]  ;;  %v1489_v6 = vld [vmem:[#allocation3 + $0x8] sm:$0xff]  ;;  %v1491_v53 = vld [vmem:[#allocation3 + $0x20] sm:$0xff] }
 0x1de   : > { %1483 = vst.msk [vmem:[#allocation3 + $0x29] sm:$0x1] %vm342_vm2, %v1477_v37  ;;  %v1467_v44 = vld [vmem:[#allocation3 + $0x4a] sm:$0x1]  ;;  %v1500_v48 = vld [vmem:[#allocation3 + $0x21] sm:$0xff]  ;;  %v3256_v55 = vld [vmem:[#allocation3 + $0x31] sm:$0xff] }
 0x1df   : > { %1472 = vst.msk [vmem:[#allocation3 + $0x30] sm:$0x1] %vm342_vm2, %v1466_v38  ;;  %v1479_v52 = vld [vmem:[#allocation3 + $0x57] sm:$0x1]  ;;  %v3269_v57 = vld [vmem:[#allocation3 + $0x39] sm:$0xff]  ;;  %v3286_v46 = vld [vmem:[#allocation3 + $0x49] sm:$0xff] }
 0x1e0   : > { %1484 = vst.msk [vmem:[#allocation3 + $0x41] sm:$0x1] %vm342_vm2, %v1478_v45  ;;  %v3258_v8 = vld [vmem:[#allocation3 + $0x32] sm:$0xff]  ;;  %v2626_v12 = vld [vmem:[%s3489_s3 + $0x20] sm:$0xf]  ;;  %v3288_v13 = vld [vmem:[#allocation3 + $0x4a] sm:$0xff] }
 0x1e1   : > { %1473 = vst.msk [vmem:[#allocation3 + $0x48] sm:$0x1] %vm342_vm2, %v1467_v44  ;;  %v2596_v51 = vld [vmem:[%s3489_s3 + $0x14] sm:$0xf]  ;;  %v2616_v54 = vld [vmem:[%s3489_s3 + $0x1c] sm:$0xf] }
 0x1e2   : > { %v1488_v41 = vld [vmem:[#allocation3] sm:$0xff]  ;;  %2550 = vmatmul.msk.f32.gmra.mxu1 %vm262_vm1, %v1498_v39  ;;  %1485 = vst.msk [vmem:[#allocation3 + $0x59] sm:$0x1] %vm342_vm2, %v1479_v52  ;;  %2597 = vmatpush.msk.msrb.mxu3 %vm430_vm0, %v2596_v51  ;;  %v1493_v14 = vld [vmem:[#allocation3 + $0x38] sm:$0xff]  ;;  %v1495_v0 = vld [vmem:[#allocation3 + $0x50] sm:$0xff] }
 0x1e3   : > { %2558 = vmatmul.msk.f32.vlgmr.msra.gmra.mxu2 %vm262_vm1, %v1488_v41  ;;  %v1644_v42 = vld [vmem:[#allocation3 + $0xa] sm:$0xff]  ;;  %2617 = vmatpush.msk.msra.mxu1 %vm430_vm0, %v2616_v54  ;;  %v2606_v61 = vld [vmem:[%s3489_s3 + $0x18] sm:$0xf]  ;;  %v1468_v59 = vld [vmem:[#allocation3 + $0x62] sm:$0x1] }
 0x1e4   : > { %2569 = vmatmul.msk.f32.gmra.mxu3 %vm262_vm1, %v1644_v42  ;;  %v1490_v49 = vld [vmem:[#allocation3 + $0x18] sm:$0xff]  ;;  %2627 = vmatpush.msk.msra.mxu2 %vm430_vm0, %v2626_v12  ;;  %1474 = vst.msk [vmem:[#allocation3 + $0x60] sm:$0x1] %vm342_vm2, %v1468_v59  ;;  %v1737_v26 = vld [vmem:[#allocation3 + $0x68] sm:$0xff]  ;;  %v1996_v35 = vld [vmem:[#allocation3 + $0x80] sm:$0xff] }
 0x1e5   : > { %v1646_v50 = vld [vmem:[#allocation3 + $0x22] sm:$0xff]  ;;  %2607 = vmatpush.msk.msra.mxu0 %vm430_vm0, %v2606_v61  ;;  %v3300_v58 = vld [vmem:[#allocation3 + $0x51] sm:$0xff]  ;;  %v1480_v25 = vld [vmem:[#allocation3 + $0x6f] sm:$0x1] }
 0x1e6   : > { %v1492_v56 = vld [vmem:[#allocation3 + $0x30] sm:$0xff]  ;;  %v1469_v47 = vld [vmem:[#allocation3 + $0x7a] sm:$0x1]  ;;  %1486 = vst.msk [vmem:[#allocation3 + $0x71] sm:$0x1] %vm342_vm2, %v1480_v25  ;;  %v1908_v5 = vld [vmem:[#allocation3 + $0x62] sm:$0xff] }
 0x1e7   : > { %v3271_v60 = vld [vmem:[#allocation3 + $0x3a] sm:$0xff]  ;;  %2608 = vmatmul.msk.f32.vlgmr.msra.gmra.mxu0 %vm262_vm1, %v1492_v56  ;;  %1475 = vst.msk [vmem:[#allocation3 + $0x78] sm:$0x1] %vm342_vm2, %v1469_v47  ;;  %v1823_v9 = vld [vmem:[#allocation3 + $0x69] sm:$0xff]  ;;  %v1481_v29 = vld [vmem:[#allocation3 + $0x87] sm:$0x1] }
 0x1e8   : > { %v1494_v62 = vld [vmem:[#allocation3 + $0x48] sm:$0xff]  ;;  %1487 = vst.msk [vmem:[#allocation3 + $0x89] sm:$0x1] %vm342_vm2, %v1481_v29  ;;  %v2081_v31 = vld [vmem:[#allocation3 + $0x79] sm:$0xff] }
 0x1e9   : > { %v3302_v11 = vld [vmem:[#allocation3 + $0x52] sm:$0xff]  ;;  %v1822_v3 = vld [vmem:[#allocation3 + $0x61] sm:$0xff] }
 0x1ea   : > { %2551 = vmatmul.msk.f32.gmra.mxu1 %vm262_vm1, %v1499_v18  ;;  %v2167_v39 = vld [vmem:[#allocation3 + $0x7a] sm:$0xff] }
 0x1eb   : > { %2559 = vmatmul.msk.f32.gmra.mxu2 %vm262_vm1, %v1489_v6  ;;  %v1736_v1 = vld [vmem:[#allocation3 + $0x60] sm:$0xff] }
 0x1ec   : > { %2570 = vmatmul.msk.f32.gmra.mxu3 %vm262_vm1, %v1645_v43  ;;  %v2082_v41 = vld [vmem:[#allocation3 + $0x81] sm:$0xff] }
 0x1ed   : > { %v1909_v7 = vld [vmem:[#allocation3 + $0x6a] sm:$0xff] }
 0x1ee   : > { %v1995_v10 = vld [vmem:[#allocation3 + $0x78] sm:$0xff] }
 0x1ef   : > { %2609 = vmatmul.msk.f32.gmra.mxu0 %vm262_vm1, %v1493_v14 }
 0x1f2   : > { %2552 = vmatmul.msk.f32.gmra.mxu1 %vm262_vm1, %v1500_v48 }
 0x1f3   : > { %2560 = vmatmul.msk.f32.gmra.mxu2 %vm262_vm1, %v1490_v49 }
 0x1f4   : > { %2571 = vmatmul.msk.f32.gmra.mxu3 %vm262_vm1, %v1646_v50 }
 0x1f7   : > { %2610 = vmatmul.msk.f32.gmra.mxu0 %vm262_vm1, %v1494_v62 }
 0x1fa   : > { %2553 = vmatmul.msk.f32.gmra.mxu1 %vm262_vm1, %v3256_v55 }
 0x1fb   : > { %2561 = vmatmul.msk.f32.gmra.mxu2 %vm262_vm1, %v1491_v53 }
 0x1fc   : > { %2572 = vmatmul.msk.f32.gmra.mxu3 %vm262_vm1, %v3258_v8 }
 0x1ff   : > { %2611 = vmatmul.msk.f32.gmra.mxu0 %vm262_vm1, %v1495_v0 }
 0x202   : > { %2554 = vmatmul.msk.f32.gmra.mxu1 %vm262_vm1, %v3269_v57 }
 0x203   : > { %2562 = vmatmul.msk.f32.gmra.mxu2 %vm262_vm1, %v1492_v56 }
 0x204   : > { %2573 = vmatmul.msk.f32.gmra.mxu3 %vm262_vm1, %v3271_v60 }
 0x207   : > { %2612 = vmatmul.msk.f32.gmra.mxu0 %vm262_vm1, %v1736_v1 }
 0x20a   : > { %2555 = vmatmul.msk.f32.gmra.mxu1 %vm262_vm1, %v3286_v46 }
 0x20b   : > { %2563 = vmatmul.msk.f32.gmra.mxu2 %vm262_vm1, %v1493_v14 }
 0x20c   : > { %2574 = vmatmul.msk.f32.gmra.mxu3 %vm262_vm1, %v3288_v13 }
 0x20f   : > { %2613 = vmatmul.msk.f32.gmra.mxu0 %vm262_vm1, %v1737_v26 }
 0x212   : > { %2556 = vmatmul.msk.f32.gmra.mxu1 %vm262_vm1, %v3300_v58 }
 0x213   : > { %2564 = vmatmul.msk.f32.gmra.mxu2 %vm262_vm1, %v1494_v62 }
 0x214   : > { %2575 = vmatmul.msk.f32.gmra.mxu3 %vm262_vm1, %v3302_v11 }
 0x217   : > { %2614 = vmatmul.msk.f32.gmra.mxu0 %vm262_vm1, %v1995_v10 }
 0x21a   : > { %2578 = vmatmul.msk.f32.vlgmr.msrb.gmra.mxu1 %vm262_vm1, %v1490_v49 }
 0x21b   : > { %2565 = vmatmul.msk.f32.gmra.mxu2 %vm262_vm1, %v1495_v0 }
 0x21c   : > { %2598 = vmatmul.msk.f32.vlgmr.msrb.gmra.mxu3 %vm262_vm1, %v1645_v43  ;;  %v2168_v43 = vld [vmem:[#allocation3 + $0x82] sm:$0xff] }
 0x21f   : > { %2615 = vmatmul.msk.f32.gmra.mxu0 %vm262_vm1, %v1996_v35 }
 0x222   : > { %2579 = vmatmul.msk.f32.gmra.mxu1 %vm262_vm1, %v1491_v53 }
 0x223   : > { %2588 = vmatmul.msk.f32.vlgmr.msrb.gmra.mxu2 %vm262_vm1, %v1499_v18 }
 0x224   : > { %2599 = vmatmul.msk.f32.gmra.mxu3 %vm262_vm1, %v1646_v50 }
 0x22a   : > { %2580 = vmatmul.msk.f32.gmra.mxu1 %vm262_vm1, %v1492_v56 }
 0x22b   : > { %2589 = vmatmul.msk.f32.gmra.mxu2 %vm262_vm1, %v1500_v48 }
 0x22c   : > { %2600 = vmatmul.msk.f32.gmra.mxu3 %vm262_vm1, %v3258_v8 }
 0x232   : > { %2581 = vmatmul.msk.f32.gmra.mxu1 %vm262_vm1, %v1493_v14 }
 0x233   : > { %2590 = vmatmul.msk.f32.gmra.mxu2 %vm262_vm1, %v3256_v55 }
 0x234   : > { %2601 = vmatmul.msk.f32.gmra.mxu3 %vm262_vm1, %v3271_v60 }
 0x23a   : > { %2582 = vmatmul.msk.f32.gmra.mxu1 %vm262_vm1, %v1494_v62 }
 0x23b   : > { %2591 = vmatmul.msk.f32.gmra.mxu2 %vm262_vm1, %v3269_v57 }
 0x23c   : > { %2602 = vmatmul.msk.f32.gmra.mxu3 %vm262_vm1, %v3288_v13 }
 0x242   : > { %2583 = vmatmul.msk.f32.gmra.mxu1 %vm262_vm1, %v1495_v0 }
 0x243   : > { %2592 = vmatmul.msk.f32.gmra.mxu2 %vm262_vm1, %v3286_v46 }
 0x244   : > { %2603 = vmatmul.msk.f32.gmra.mxu3 %vm262_vm1, %v3302_v11 }
 0x24a   : > { %2584 = vmatmul.msk.f32.gmra.mxu1 %vm262_vm1, %v1736_v1 }
 0x24b   : > { %2593 = vmatmul.msk.f32.gmra.mxu2 %vm262_vm1, %v3300_v58 }
 0x24c   : > { %2604 = vmatmul.msk.f32.gmra.mxu3 %vm262_vm1, %v1908_v5 }
 0x252   : > { %2585 = vmatmul.msk.f32.gmra.mxu1 %vm262_vm1, %v1737_v26 }
 0x253   : > { %2594 = vmatmul.msk.f32.gmra.mxu2 %vm262_vm1, %v1822_v3 }
 0x254   : > { %2605 = vmatmul.msk.f32.gmra.mxu3 %vm262_vm1, %v1909_v7 }
 0x257   : > { %v1551_v40 = vpop.f32.mrf.mxu1 }
 0x25a   : > { %2618 = vmatmul.msk.f32.vlgmr.msra.gmra.mxu1 %vm262_vm1, %v3256_v55 }
 0x25b   : > { %2595 = vmatmul.msk.f32.gmra.mxu2 %vm262_vm1, %v1823_v9 }
 0x25f   : > { %v1554_v36 = vpop.f32.mrf.mxu1  ;;  %v1697_v33 = vpop.f32.mrf.mxu3 }
 0x262   : > { %2619 = vmatmul.msk.f32.gmra.mxu1 %vm262_vm1, %v3269_v57 }
 0x263   : > { %2628 = vmatmul.msk.f32.vlgmr.msra.gmra.mxu2 %vm262_vm1, %v3258_v8 }
 0x264   : > { %v2043_v0 = vpop.f32.mrf.mxu0 }
 0x266   : > { %v1619_v22 = vpop.f32.mrf.mxu2 }
 0x267   : > { %v3358_v16 = vadd.f32 %v1619_v22, %v1551_v40  ;;  %v1557_v17 = vpop.f32.mrf.mxu1  ;;  %v1700_v30 = vpop.f32.mrf.mxu3 }
 0x269   : > { %v1721_v1 = vadd.f32 %v1697_v33, %v3358_v16  ;;  %v3420_v16 = vld [vmem:[%s3490_s4] ss:$0 sm:$0xff] }
 0x26a   : > { %2620 = vmatmul.msk.f32.gmra.mxu1 %vm262_vm1, %v3286_v46 }
 0x26b   : > { %2629 = vmatmul.msk.f32.gmra.mxu2 %vm262_vm1, %v3271_v60 }
 0x26c   : > { %v2046_v35 = vpop.f32.mrf.mxu0 }
 0x26e   : > { %v1622_v15 = vpop.f32.mrf.mxu2 }
 0x26f   : > { %v3364_v2 = vadd.f32 %v1622_v15, %v1554_v36  ;;  %v1560_v19 = vpop.f32.mrf.mxu1  ;;  %v1703_v42 = vpop.f32.mrf.mxu3 }
 0x272   : > { %2621 = vmatmul.msk.f32.gmra.mxu1 %vm262_vm1, %v3300_v58 }
 0x273   : > { %2630 = vmatmul.msk.f32.gmra.mxu2 %vm262_vm1, %v3288_v13 }
 0x276   : > { %v1625_v63 = vpop.f32.mrf.mxu2 }
 0x277   : > { %v3371_v20 = vadd.f32 %v1625_v63, %v1557_v17  ;;  %v1563_v21 = vpop.f32.mrf.mxu1  ;;  %v1706_v44 = vpop.f32.mrf.mxu3 }
 0x279   : > { %v1723_v63 = vadd.f32 %v1703_v42, %v3371_v20 }
 0x27a   : > { %2622 = vmatmul.msk.f32.gmra.mxu1 %vm262_vm1, %v1822_v3  ;;  %v1722_v3 = vadd.f32 %v1700_v30, %v3364_v2  ;;  %v2259_v2 = vld [vmem:[%s2822_s14] sm:$0xff] }
 0x27b   : > { %2631 = vmatmul.msk.f32.gmra.mxu2 %vm262_vm1, %v3302_v11 }
 0x27e   : > { %v1628_v23 = vpop.f32.mrf.mxu2 }
 0x27f   : > { %v3376_v24 = vadd.f32 %v1628_v23, %v1560_v19  ;;  %v1566_v27 = vpop.f32.mrf.mxu1  ;;  %v3393_v52 = vpop.f32.mrf.mxu3 }
 0x280   : > { %v2049_v19 = vpop.f32.mrf.mxu0 }
 0x282   : > { %2623 = vmatmul.msk.f32.gmra.mxu1 %vm262_vm1, %v1823_v9 }
 0x283   : > { %2632 = vmatmul.msk.f32.gmra.mxu2 %vm262_vm1, %v1908_v5 }
 0x286   : > { %v1631_v28 = vpop.f32.mrf.mxu2 }
 0x287   : > { %v3380_v4 = vadd.f32 %v1631_v28, %v1563_v21  ;;  %v1569_v34 = vpop.f32.mrf.mxu1  ;;  %v3395_v51 = vpop.f32.mrf.mxu3 }
 0x28a   : > { %2624 = vmatmul.msk.f32.gmra.mxu1 %vm262_vm1, %v2081_v31 }
 0x28b   : > { %2633 = vmatmul.msk.f32.gmra.mxu2 %vm262_vm1, %v1909_v7 }
 0x28e   : > { %v1634_v32 = vpop.f32.mrf.mxu2 }
 0x28f   : > { %v3384_v37 = vadd.f32 %v1634_v32, %v1566_v27  ;;  %v1572_v38 = vpop.f32.mrf.mxu1  ;;  %v3399_v12 = vpop.f32.mrf.mxu3 }
 0x292   : > { %2625 = vmatmul.msk.f32.gmra.mxu1 %vm262_vm1, %v2082_v41  ;;  %v1724_v41 = vadd.f32 %v1706_v44, %v3376_v24  ;;  %v1725_v24 = vadd.f32 %v3393_v52, %v3380_v4  ;;  %v1726_v4 = vadd.f32 %v3395_v51, %v3384_v37 }
 0x293   : > { %2634 = vmatmul.msk.f32.gmra.mxu2 %vm262_vm1, %v2167_v39 }
 0x296   : > { %v1637_v45 = vpop.f32.mrf.mxu2 }
 0x297   : > { %v3388_v6 = vadd.f32 %v1637_v45, %v1569_v34  ;;  %v1784_v18 = vpop.f32.mrf.mxu1  ;;  %v3403_v46 = vpop.f32.mrf.mxu3 }
 0x298   : > { %v1808_v47 = vadd.f32 %v1784_v18, %v1721_v1  ;;  %v2052_v45 = vpop.f32.mrf.mxu0  ;;  %v2260_v18 = vld [vmem:[%s2822_s14 + $0x8] sm:$0xff] }
 0x299   : > { %v1727_v51 = vadd.f32 %v3399_v12, %v3388_v6 }
 0x29b   : > { %2635 = vmatmul.msk.f32.gmra.mxu2 %vm262_vm1, %v2168_v43 }
 0x29e   : > { %v1640_v49 = vpop.f32.mrf.mxu2 }
 0x29f   : > { %v3391_v48 = vadd.f32 %v1640_v49, %v1572_v38  ;;  %v1787_v50 = vpop.f32.mrf.mxu1  ;;  %v1956_v62 = vpop.f32.mrf.mxu3 }
 0x2a0   : > { %v1809_v9 = vadd.f32 %v1787_v50, %v1722_v3 }
 0x2a1   : > { %v1728_v6 = vadd.f32 %v3403_v46, %v3391_v48 }
 0x2a6   : > { %v1870_v53 = vpop.f32.mrf.mxu2 }
 0x2a7   : > { %v1790_v55 = vpop.f32.mrf.mxu1  ;;  %v1959_v26 = vpop.f32.mrf.mxu3  ;;  %v1894_v10 = vadd.f32 %v1870_v53, %v1808_v47 }
 0x2a8   : > { %v1810_v27 = vadd.f32 %v1790_v55, %v1723_v63  ;;  %v2055_v47 = vpop.f32.mrf.mxu0 }
 0x2a9   : > { %v1980_v7 = vadd.f32 %v1956_v62, %v1894_v10 }
 0x2ab   : > { %v2067_v22 = vadd.f32 %v2043_v0, %v1980_v7 }
 0x2ae   : > { %v1873_v8 = vpop.f32.mrf.mxu2 }
 0x2af   : > { %v1793_v56 = vpop.f32.mrf.mxu1  ;;  %v1962_v36 = vpop.f32.mrf.mxu3  ;;  %v1895_v17 = vadd.f32 %v1873_v8, %v1809_v9 }
 0x2b0   : > { %v1811_v43 = vadd.f32 %v1793_v56, %v1724_v41  ;;  %v2264_v41 = vld [vmem:[%s2822_s14 + $0x28] sm:$0xff] }
 0x2b1   : > { %v1981_v21 = vadd.f32 %v1959_v26, %v1895_v17  ;;  %v2261_v26 = vld [vmem:[%s2822_s14 + $0x10] sm:$0xff] }
 0x2b3   : > { %v2068_v30 = vadd.f32 %v2046_v35, %v1981_v21 }
 0x2b6   : > { %v1876_v57 = vpop.f32.mrf.mxu2 }
 0x2b7   : > { %v3397_v60 = vpop.f32.mrf.mxu1  ;;  %v1896_v34 = vadd.f32 %v1876_v57, %v1810_v27  ;;  %v1965_v32 = vpop.f32.mrf.mxu3 }
 0x2b8   : > { %v1812_v56 = vadd.f32 %v3397_v60, %v1725_v24  ;;  %v2262_v60 = vld [vmem:[%s2822_s14 + $0x18] sm:$0xff] }
 0x2b9   : > { %v1982_v20 = vadd.f32 %v1962_v36, %v1896_v34 }
 0x2bb   : > { %v2069_v53 = vadd.f32 %v2049_v19, %v1982_v20 }
 0x2be   : > { %v1879_v54 = vpop.f32.mrf.mxu2 }
 0x2bf   : > { %v3401_v14 = vpop.f32.mrf.mxu1  ;;  %v1897_v55 = vadd.f32 %v1879_v54, %v1811_v43  ;;  %v1968_v62 = vpop.f32.mrf.mxu3 }
 0x2c1   : > { %v1983_v44 = vadd.f32 %v1965_v32, %v1897_v55  ;;  %v2265_v55 = vld [vmem:[%s2822_s14 + $0x30] sm:$0xff] }
 0x2c3   : > { %v2070_v54 = vadd.f32 %v2052_v45, %v1983_v44  ;;  %v2266_v44 = vld [vmem:[%s2822_s14 + $0x38] sm:$0xff] }
 0x2c6   : > { %v1882_v13 = vpop.f32.mrf.mxu2 }
 0x2c7   : > { %v3405_v61 = vpop.f32.mrf.mxu1  ;;  %v1898_v10 = vadd.f32 %v1882_v13, %v1812_v56  ;;  %v1971_v36 = vpop.f32.mrf.mxu3 }
 0x2c9   : > { %v1984_v52 = vadd.f32 %v1968_v62, %v1898_v10 }
 0x2cb   : > { %v2071_v13 = vadd.f32 %v2055_v47, %v1984_v52 }
 0x2ce   : > { %v3407_v58 = vpop.f32.mrf.mxu2 }
 0x2cf   : > { %v3409_v11 = vpop.f32.mrf.mxu1 }
 0x2d0   : > { %v1815_v20 = vadd.f32 %v3409_v11, %v1728_v6 }
 0x2d6   : > { %v3411_v59 = vpop.f32.mrf.mxu2 }
 0x2d7   : > { %v2129_v25 = vpop.f32.mrf.mxu1 }
 0x2d8   : > { %v2153_v15 = vadd.f32 %v2129_v25, %v2067_v22  ;;  %v1813_v22 = vadd.f32 %v3401_v14, %v1726_v4  ;;  %v2263_v14 = vld [vmem:[%s2822_s14 + $0x20] sm:$0xff] }
 0x2de   : > { %v3414_v5 = vpop.f32.mrf.mxu2 }
 0x2df   : > { %v2132_v40 = vpop.f32.mrf.mxu1  ;;  %v1901_v45 = vadd.f32 %v3414_v5, %v1815_v20 }
 0x2e0   : > { %v2154_v38 = vadd.f32 %v2132_v40, %v2068_v30 }
 0x2e6   : > { %v2215_v29 = vpop.f32.mrf.mxu2 }
 0x2e7   : > { %v2239_v33 = vadd.f32 %v2215_v29, %v2153_v15  ;;  %v2135_v23 = vpop.f32.mrf.mxu1  ;;  %v1899_v15 = vadd.f32 %v3407_v58, %v1813_v22  ;;  %v2058_v29 = vpop.f32.mrf.mxu0 }
 0x2e8   : > { %v2155_v57 = vadd.f32 %v2135_v23, %v2069_v53  ;;  %v1814_v23 = vadd.f32 %v3405_v61, %v1727_v51  ;;  %v1974_v58 = vpop.f32.mrf.mxu3 }
 0x2e9   : > { %v2251_v28 = vadd.f32 %v3420_v16, %v2239_v33  ;;  %v1985_v33 = vadd.f32 %v1971_v36, %v1899_v15 }
 0x2ea   : > { %v1900_v30 = vadd.f32 %v3411_v59, %v1814_v23 }
 0x2eb   : > { %v2267_v31 = vadd.f32 %v2259_v2, %v2251_v28  ;;  %v2072_v28 = vadd.f32 %v2058_v29, %v1985_v33 }
 0x2ec   : > { %v1986_v12 = vadd.f32 %v1974_v58, %v1900_v30 }
 0x2ed   : > { %2275 = vst.msk [vmem:[%s2835_s28] sm:$0xff] %vm262_vm1, %v2267_v31 }
 0x2ee   : > { %v2218_v39 = vpop.f32.mrf.mxu2 }
 0x2ef   : > { %v2240_v42 = vadd.f32 %v2218_v39, %v2154_v38  ;;  %v2138_v50 = vpop.f32.mrf.mxu1  ;;  %v2061_v32 = vpop.f32.mrf.mxu0 }
 0x2f0   : > { %v2156_v7 = vadd.f32 %v2138_v50, %v2070_v54  ;;  %v2073_v59 = vadd.f32 %v2061_v32, %v1986_v12  ;;  %v1977_v43 = vpop.f32.mrf.mxu3 }
 0x2f1   : > { %v2252_v49 = vadd.f32 %v3420_v16, %v2240_v42  ;;  %v1987_v46 = vadd.f32 %v1977_v43, %v1901_v45 }
 0x2f3   : > { %v2268_v8 = vadd.f32 %v2260_v18, %v2252_v49 }
 0x2f5   : > { %2276 = vst.msk [vmem:[%s2835_s28 + $0x8] sm:$0xff] %vm262_vm1, %v2268_v8 }
 0x2f6   : > { %v2221_v0 = vpop.f32.mrf.mxu2 }
 0x2f7   : > { %v2241_v1 = vadd.f32 %v2221_v0, %v2155_v57  ;;  %v2141_v3 = vpop.f32.mrf.mxu1  ;;  %v2064_v53 = vpop.f32.mrf.mxu0 }
 0x2f8   : > { %v2157_v63 = vadd.f32 %v2141_v3, %v2071_v13  ;;  %v2074_v57 = vadd.f32 %v2064_v53, %v1987_v46 }
 0x2f9   : > { %v2253_v25 = vadd.f32 %v3420_v16, %v2241_v1 }
 0x2fb   : > { %v2269_v35 = vadd.f32 %v2261_v26, %v2253_v25 }
 0x2fd   : > { %2277 = vst.msk [vmem:[%s2835_s28 + $0x10] sm:$0xff] %vm262_vm1, %v2269_v35 }
 0x2fe   : > { %v2224_v40 = vpop.f32.mrf.mxu2 }
 0x2ff   : > { %v2242_v9 = vadd.f32 %v2224_v40, %v2156_v7  ;;  %v2144_v21 = vpop.f32.mrf.mxu1 }
 0x300   : > { %v2158_v31 = vadd.f32 %v2144_v21, %v2072_v28 }
 0x301   : > { %v2254_v17 = vadd.f32 %v3420_v16, %v2242_v9 }
 0x303   : > { %v2270_v19 = vadd.f32 %v2262_v60, %v2254_v17 }
 0x305   : > { %2278 = vst.msk [vmem:[%s2835_s28 + $0x18] sm:$0xff] %vm262_vm1, %v2270_v19 }
 0x306   : > { %v2227_v37 = vpop.f32.mrf.mxu2 }
 0x307   : > { %v2243_v2 = vadd.f32 %v2227_v37, %v2157_v63  ;;  %v2147_v61 = vpop.f32.mrf.mxu1 }
 0x308   : > { %v2159_v49 = vadd.f32 %v2147_v61, %v2073_v59 }
 0x309   : > { %v2255_v27 = vadd.f32 %v3420_v16, %v2243_v2 }
 0x30b   : > { %v2271_v34 = vadd.f32 %v2263_v14, %v2255_v27 }
 0x30d   : > { %2279 = vst.msk [vmem:[%s2835_s28 + $0x20] sm:$0xff] %vm262_vm1, %v2271_v34 }
 0x30e   : > { %v2230_v38 = vpop.f32.mrf.mxu2 }
 0x30f   : > { %v2244_v39 = vadd.f32 %v2230_v38, %v2158_v31  ;;  %v2150_v8 = vpop.f32.mrf.mxu1 }
 0x310   : > { %v2160_v0 = vadd.f32 %v2150_v8, %v2074_v57 }
 0x311   : > { %v2256_v42 = vadd.f32 %v3420_v16, %v2244_v39 }
 0x313   : > { %v2272_v18 = vadd.f32 %v2264_v41, %v2256_v42 }
 0x315   : > { %2280 = vst.msk [vmem:[%s2835_s28 + $0x28] sm:$0xff] %vm262_vm1, %v2272_v18 }
 0x316   : > { %v2233_v48 = vpop.f32.mrf.mxu2 }
 0x317   : > { %v2245_v50 = vadd.f32 %v2233_v48, %v2159_v49 }
 0x319   : > { %v2257_v11 = vadd.f32 %v3420_v16, %v2245_v50 }
 0x31b   : > { %v2273_v62 = vadd.f32 %v2265_v55, %v2257_v11 }
 0x31d   : > { %2281 = vst.msk [vmem:[%s2835_s28 + $0x30] sm:$0xff] %vm262_vm1, %v2273_v62 }
 0x31e   : > { %v2236_v5 = vpop.f32.mrf.mxu2 }
 0x31f   : > { %v2246_v24 = vadd.f32 %v2236_v5, %v2160_v0 }
 0x321   : > { %v2258_v1 = vadd.f32 %v3420_v16, %v2246_v24 }
 0x323   : > { %v2274_v26 = vadd.f32 %v2266_v44, %v2258_v1 }
 0x325   : > { %2282 = vst.msk [vmem:[%s2835_s28 + $0x38] sm:$0xff] %vm262_vm1, %v2274_v26 }
 0x326 PF: > { %s15_s22 = sadd.s32 1, %s2731_s22   ;;  %s3492_s18 = smov %s2723_s20 }
 0x327   : > { %p12_p11 = scmp.ge.s32.totalorder %s15_s22, 10   ;;  %s3493_s19 = smov %s2727_s21 }
 0x328   : > { %s3494_s20 = smov %s3497_s23  ;;  %s3495_s21 = smov %s3501_s24 }
 0x329   :  { %14 = sbr.rel (!%p12_p11) target bundleno = 3 (0x3), region = 108 }

</bundles_post_ra>
